<compile_context>
chip_gen: v7x
topology: tpu7x:2x2x1
jax: 0.10.0
libtpu: 0.0.40
codegen_flags: <defaults>
</compile_context>

<pallas_src>
import functools

import jax
import jax.numpy as jnp
from jax.experimental import pallas as pl
from jax.experimental.pallas import tpu as pltpu

MAX_K = 15           # largest conv kernel
MAX_PAD = 7          # its half width
GLOBAL_OUT = 576     # global_fc output dim (fixed by the module)
CNN_OUT = (256, 128, 64)
CNN_K = (5, 9, 15)
CONV_OUT = sum(CNN_OUT)              # 448
FC1_IN = GLOBAL_OUT + CONV_OUT       # 1024
FC1_OUT, FC2_OUT = 512, 256
BN_EPS = 1e-5


def _round_up(x, m):
    return ((x + m - 1) // m) * m


def _tile_config(B, L):
    """Per-generation batch tile TB, sequence chunk TL and VMEM limit."""
    try:
        vmem_cap = pltpu.get_tpu_info().vmem_capacity_bytes
    except Exception:                    # unknown chip: assume 64 MiB (safe everywhere)
        vmem_cap = 64 << 20
    if vmem_cap >= (100 << 20):          # v5e / v6e: 128 MiB VMEM, single TensorCore
        tb_target = 256                  # fills v6e 256-row MXU; >=128 for v5e
        conv_rows = 8192                 # TB*TL bound -> ~15 MB f32 conv intermediate
        vmem_limit = 104 << 20
        two_cores = False
    else:                                # v7x-like: 64 MiB VMEM per TensorCore, 2 TCs
        tb_target = 128
        conv_rows = 4096                 # ~7.3 MB f32 conv intermediate
        vmem_limit = 52 << 20
        two_cores = True

    TB = min(tb_target, _round_up(B, 8))
    # keep both TensorCores busy on v7x when B is large enough for 2 tiles
    if two_cores and _round_up(B, 8) > 8 and _round_up(B, 8) <= TB:
        TB = max(8, _round_up(_round_up(B, 8) // 2, 8))

    TL = max(8, (max(conv_rows // TB, 8) // 8) * 8)
    TL = min(TL, _round_up(L, 8))
    return TB, TL, vmem_limit


def gln_kernel(xcol_ref, g_ref,
               wconv_ref, bconv_ref, wg_ref, bg_ref,
               wfc1g_ref, wfc1c_ref, bfc1_ref,
               wfc2_ref, bfc2_ref, wfc3_ref, bfc3_ref,
               out_ref, acc_ref,
               *, inv_len, seq_len, tb, tl, cdt, needs_mask):
    l = pl.program_id(1)
    nl = pl.num_programs(1)

    @pl.when(l == 0)
    def _():
        acc_ref[...] = jnp.zeros_like(acc_ref)

    # ---- three Conv1d -> bias -> ReLU branches fused into ONE im2col matmul ----
    kc = xcol_ref.shape[-1]
    xcol = xcol_ref[...].reshape(tb * tl, kc)                         # (TB*TL, K*C)
    conv = jnp.dot(xcol, wconv_ref[...], preferred_element_type=jnp.float32)
    conv = jnp.maximum(conv + bconv_ref[...], 0.0)                    # (TB*TL, 448) f32
    conv = conv.reshape(tb, tl, CONV_OUT)                             # (TB, TL, 448)

    if needs_mask:  # static: only when L % TL != 0 -> zero padded positions
        pos = l * tl + jax.lax.broadcasted_iota(jnp.int32, (1, tl, 1), 1)
        conv = jnp.where(pos < seq_len, conv, 0.0)

    # AdaptiveAvgPool1d(1): f32 partial sum over this L-chunk (XLU reduce, no MXU).
    acc_ref[...] += jnp.sum(conv, axis=1)                             # (TB, 448) f32

    @pl.when(l == nl - 1)
    def _():
        pooled = acc_ref[...] * inv_len                               # exact 1/L, f32

        # ---- global branch ----
        gfeat = jnp.dot(g_ref[...], wg_ref[...],
                        preferred_element_type=jnp.float32) + bg_ref[...]   # (TB, 576)

        # ---- fc1 over concat([gfeat, pooled]) as two partial matmuls ----
        h = jnp.dot(gfeat.astype(cdt), wfc1g_ref[...],
                    preferred_element_type=jnp.float32)
        h = h + jnp.dot(pooled.astype(cdt), wfc1c_ref[...],
                        preferred_element_type=jnp.float32)
        h = jnp.maximum(h + bfc1_ref[...], 0.0)                       # (TB, 512)

        # eval-mode BatchNorm1d folded into wfc2/bfc2 (module order: fc1->ReLU->BN->Dropout->fc2);
        # Dropout == identity in eval mode.
        h = jnp.maximum(jnp.dot(h.astype(cdt), wfc2_ref[...],
                                preferred_element_type=jnp.float32) + bfc2_ref[...], 0.0)

        out = jnp.dot(h.astype(cdt), wfc3_ref[...],
                      preferred_element_type=jnp.float32) + bfc3_ref[...]   # (TB, NC_pad)
        out_ref[...] = out.astype(out_ref.dtype)


def glnet_forward(params, global_features, local_features, mask=None,
                  compute_dtype=jnp.bfloat16):
    """global_features: (B, global_dim); local_features: (B, L, local_dim);
    mask: optional (B, L).  Returns (B, num_classes)."""
    B, L, C = local_features.shape
    Gdim = global_features.shape[1]
    num_classes = params["wfc3"].shape[1]
    KC = MAX_K * C
    NC_pad = _round_up(num_classes, 128)       # lane-dense output
    cdt = compute_dtype

    TB, TL, vmem_limit = _tile_config(B, L)
    B_pad = _round_up(B, TB)
    L_pad = _round_up(L, TL)
    needs_mask = (L_pad != L)

    # ---- local features: mask, pad, im2col -> (B_pad, L_pad, K*C) ----
    x = local_features.astype(jnp.float32)
    if mask is not None:
        x = x * mask.astype(jnp.float32)[:, :, None]
    x = jnp.pad(x, ((0, B_pad - B), (0, L_pad - L), (0, 0)))
    xh = jnp.pad(x, ((0, 0), (MAX_PAD, MAX_PAD), (0, 0)))             # conv zero padding
    x_col = jnp.concatenate([xh[:, j:j + L_pad, :] for j in range(MAX_K)], axis=-1)
    x_col = x_col.astype(cdt)                                         # (B_pad, L_pad, KC)

    g = jnp.pad(global_features.astype(jnp.float32), ((0, B_pad - B), (0, 0))).astype(cdt)

    # ---- fuse the three conv weights (zero-padded to 15 taps) into one (K*C, 448) matrix ----
    wc = jnp.zeros((MAX_K, C, CONV_OUT), jnp.float32)
    wc = wc.at[5:10, :, 0:256].set(params["w1"])      # k=5,  pad=2 -> taps 5..9
    wc = wc.at[3:12, :, 256:384].set(params["w2"])    # k=9,  pad=4 -> taps 3..11
    wc = wc.at[0:15, :, 384:448].set(params["w3"])    # k=15, pad=7 -> taps 0..14
    wc = wc.reshape(KC, CONV_OUT).astype(cdt)
    bc = jnp.concatenate([params["b1"], params["b2"], params["b3"]], axis=1)   # (1, 448) f32

    # ---- fc1 split at the concat boundary; eval BN folded into fc2; fc3 lane-padded ----
    wfc1_g = params["wfc1"][:GLOBAL_OUT].astype(cdt)
    wfc1_c = params["wfc1"][GLOBAL_OUT:].astype(cdt)
    bfc1 = params["bfc1"]

    scale = params["bn_gamma"] * jax.lax.rsqrt(params["bn_var"] + BN_EPS)      # (1, 512)
    shift = params["bn_beta"] - params["bn_mean"] * scale
    wfc2_f = (params["wfc2"] * scale.reshape(-1, 1)).astype(cdt)
    bfc2_f = params["bfc2"] + shift @ params["wfc2"]

    wfc3_p = jnp.pad(params["wfc3"], ((0, 0), (0, NC_pad - num_classes))).astype(cdt)
    bfc3_p = jnp.pad(params["bfc3"], ((0, 0), (0, NC_pad - num_classes)))

    wg = params["wg"].astype(cdt)
    bg = params["bg"]

    grid = (B_pad // TB, L_pad // TL)
    wmap = lambda i, l: (0, 0)   # resident weights/biases: constant block -> DMA'd once

    flops = int(2 * B_pad * L_pad * KC * CONV_OUT
                + 2 * B_pad * (Gdim * GLOBAL_OUT + GLOBAL_OUT * FC1_OUT
                               + CONV_OUT * FC1_OUT + FC1_OUT * FC2_OUT
                               + FC2_OUT * NC_pad))
    itemsize = jnp.dtype(cdt).itemsize
    bytes_accessed = int((x_col.size + g.size + wc.size + wg.size
                          + wfc1_g.size + wfc1_c.size + wfc2_f.size + wfc3_p.size) * itemsize
                         + B_pad * NC_pad * 4)

    kernel = functools.partial(gln_kernel, inv_len=1.0 / L, seq_len=L,
                               tb=TB, tl=TL, cdt=cdt, needs_mask=needs_mask)

    out = pl.pallas_call(
        kernel,
        out_shape=jax.ShapeDtypeStruct((B_pad, NC_pad), jnp.float32),
        grid=grid,
        in_specs=[
            pl.BlockSpec((TB, TL, KC), lambda i, l: (i, l, 0)),   # im2col local feats
            pl.BlockSpec((TB, Gdim), lambda i, l: (i, 0)),        # global features
            pl.BlockSpec((KC, CONV_OUT), wmap),                   # fused conv weight
            pl.BlockSpec((1, CONV_OUT), wmap),                    # fused conv bias
            pl.BlockSpec((Gdim, GLOBAL_OUT), wmap),               # wg
            pl.BlockSpec((1, GLOBAL_OUT), wmap),                  # bg
            pl.BlockSpec((GLOBAL_OUT, FC1_OUT), wmap),            # wfc1 (global half)
            pl.BlockSpec((CONV_OUT, FC1_OUT), wmap),              # wfc1 (conv half)
            pl.BlockSpec((1, FC1_OUT), wmap),                     # bfc1
            pl.BlockSpec((FC1_OUT, FC2_OUT), wmap),               # wfc2 (BN folded)
            pl.BlockSpec((1, FC2_OUT), wmap),                     # bfc2 (BN folded)
            pl.BlockSpec((FC2_OUT, NC_pad), wmap),                # wfc3 (lane-padded)
            pl.BlockSpec((1, NC_pad), wmap),                      # bfc3 (lane-padded)
        ],
        out_specs=pl.BlockSpec((TB, NC_pad), lambda i, l: (i, 0)),
        scratch_shapes=[pltpu.VMEM((TB, CONV_OUT), jnp.float32)],  # pooled-sum accumulator
        compiler_params=pltpu.CompilerParams(
            dimension_semantics=("parallel", "arbitrary"),
            vmem_limit_bytes=vmem_limit),
        cost_estimate=pl.CostEstimate(flops=flops, transcendentals=0,
                                      bytes_accessed=bytes_accessed),
    )(x_col, g, wc, bc, wg, bg, wfc1_g, wfc1_c, bfc1, wfc2_f, bfc2_f, wfc3_p, bfc3_p)

    return out[:B, :num_classes]


def init_params(key, global_dim, local_dim, num_classes=53):
    keys = jax.random.split(key, 8)

    def linear(k, fin, fout):
        kw, kb = jax.random.split(k)
        bound = 1.0 / (fin ** 0.5)
        w = jax.random.uniform(kw, (fin, fout), jnp.float32, -bound, bound)
        b = jax.random.uniform(kb, (1, fout), jnp.float32, -bound, bound)
        return w, b

    def conv1d(k, cin, cout, K):
        kw, kb = jax.random.split(k)
        bound = 1.0 / ((cin * K) ** 0.5)
        w = jax.random.uniform(kw, (K, cin, cout), jnp.float32, -bound, bound)
        b = jax.random.uniform(kb, (1, cout), jnp.float32, -bound, bound)
        return w, b

    wg, bg = linear(keys[0], global_dim, GLOBAL_OUT)
    w1, b1 = conv1d(keys[1], local_dim, CNN_OUT[0], CNN_K[0])
    w2, b2 = conv1d(keys[2], local_dim, CNN_OUT[1], CNN_K[1])
    w3, b3 = conv1d(keys[3], local_dim, CNN_OUT[2], CNN_K[2])
    wfc1, bfc1 = linear(keys[4], FC1_IN, FC1_OUT)
    wfc2, bfc2 = linear(keys[5], FC1_OUT, FC2_OUT)
    wfc3, bfc3 = linear(keys[6], FC2_OUT, num_classes)

    return dict(
        wg=wg, bg=bg,
        w1=w1, b1=b1, w2=w2, b2=b2, w3=w3, b3=b3,
        wfc1=wfc1, bfc1=bfc1,
        bn_gamma=jnp.ones((1, FC1_OUT), jnp.float32),
        bn_beta=jnp.zeros((1, FC1_OUT), jnp.float32),
        bn_mean=jnp.zeros((1, FC1_OUT), jnp.float32),
        bn_var=jnp.ones((1, FC1_OUT), jnp.float32),
        wfc2=wfc2, bfc2=bfc2,
        wfc3=wfc3, bfc3=bfc3,
    )


if __name__ == "__main__":
    key = jax.random.PRNGKey(0)
    B, L = 2, 8
    global_dim, local_dim, num_classes = 32, 4, 53

    kg, kl, km, kp = jax.random.split(key, 4)
    global_features = jax.random.normal(kg, (B, global_dim), jnp.float32)
    local_features = jax.random.normal(kl, (B, L, local_dim), jnp.float32)
    mask = (jax.random.uniform(km, (B, L)) > 0.2).astype(jnp.float32)

    params = init_params(kp, global_dim, local_dim, num_classes)

    out = glnet_forward(params, global_features, local_features, mask)
    out = jax.block_until_ready(out)
    assert out.shape == (B, num_classes), out.shape
    assert bool(jnp.all(jnp.isfinite(out)))
    print("KERNEL_OK")
</pallas_src>

<mosaic_0001>
module attributes {stable_mosaic.version = 11 : i64} {
  func.func @gln_kernel(%arg0: i32, %arg1: i32, %arg2: memref<8x8x60xbf16, #tpu.memory_space<vmem>>, %arg3: memref<8x32xbf16, #tpu.memory_space<vmem>>, %arg4: memref<60x448xbf16, #tpu.memory_space<vmem>>, %arg5: memref<1x448xf32, #tpu.memory_space<vmem>>, %arg6: memref<32x576xbf16, #tpu.memory_space<vmem>>, %arg7: memref<1x576xf32, #tpu.memory_space<vmem>>, %arg8: memref<576x512xbf16, #tpu.memory_space<vmem>>, %arg9: memref<448x512xbf16, #tpu.memory_space<vmem>>, %arg10: memref<1x512xf32, #tpu.memory_space<vmem>>, %arg11: memref<512x256xbf16, #tpu.memory_space<vmem>>, %arg12: memref<1x256xf32, #tpu.memory_space<vmem>>, %arg13: memref<256x128xbf16, #tpu.memory_space<vmem>>, %arg14: memref<1x128xf32, #tpu.memory_space<vmem>>, %arg15: memref<8x128xf32, #tpu.memory_space<vmem>>, %arg16: memref<8x448xf32, #tpu.memory_space<vmem>>) attributes {dimension_semantics = [#tpu.dimension_semantics<parallel>, #tpu.dimension_semantics<arbitrary>], iteration_bounds = array<i64: 1, 1>, scalar_prefetch = 0 : i64, scratch_operands = 1 : i64, tpu.core_type = #tpu.core_type<tc>, window_params = [{transform_indices = @transform_0, window_bounds = array<i64: 8, 8, 60>}, {transform_indices = @transform_1, window_bounds = array<i64: 8, 32>}, {pipeline_mode = #tpu.pipeline_mode<synchronous>, transform_indices = @transform_2, window_bounds = array<i64: 60, 448>}, {pipeline_mode = #tpu.pipeline_mode<synchronous>, transform_indices = @transform_3, window_bounds = array<i64: 1, 448>}, {pipeline_mode = #tpu.pipeline_mode<synchronous>, transform_indices = @transform_4, window_bounds = array<i64: 32, 576>}, {pipeline_mode = #tpu.pipeline_mode<synchronous>, transform_indices = @transform_5, window_bounds = array<i64: 1, 576>}, {pipeline_mode = #tpu.pipeline_mode<synchronous>, transform_indices = @transform_6, window_bounds = array<i64: 576, 512>}, {pipeline_mode = #tpu.pipeline_mode<synchronous>, transform_indices = @transform_7, window_bounds = array<i64: 448, 512>}, {pipeline_mode = #tpu.pipeline_mode<synchronous>, transform_indices = @transform_8, window_bounds = array<i64: 1, 512>}, {pipeline_mode = #tpu.pipeline_mode<synchronous>, transform_indices = @transform_9, window_bounds = array<i64: 512, 256>}, {pipeline_mode = #tpu.pipeline_mode<synchronous>, transform_indices = @transform_10, window_bounds = array<i64: 1, 256>}, {pipeline_mode = #tpu.pipeline_mode<synchronous>, transform_indices = @transform_11, window_bounds = array<i64: 256, 128>}, {pipeline_mode = #tpu.pipeline_mode<synchronous>, transform_indices = @transform_12, window_bounds = array<i64: 1, 128>}, {transform_indices = @transform_13, window_bounds = array<i64: 8, 128>}]} {
    %c0_i32 = arith.constant 0 : i32
    %0 = arith.cmpi eq, %arg1, %c0_i32 : i32
    %1 = arith.extui %0 : i1 to i32
    %c0_i32_0 = arith.constant 0 : i32
    %2 = arith.cmpi ne, %1, %c0_i32_0 : i32
    scf.if %2 {
      %cst_15 = arith.constant 0.000000e+00 : f32
      %20 = vector.broadcast %cst_15 : f32 to vector<8x448xf32>
      %c0_16 = arith.constant 0 : index
      %c0_17 = arith.constant 0 : index
      %21 = vector.load %arg16[%c0_16, %c0_17] : memref<8x448xf32, #tpu.memory_space<vmem>>, vector<8x448xf32>
      tpu.vector_store %arg16[%c0_16, %c0_17], %20 {strides = array<i32>} : memref<8x448xf32, #tpu.memory_space<vmem>>, vector<8x448xf32>,
    } else {
    }
    %c0 = arith.constant 0 : index
    %c0_1 = arith.constant 0 : index
    %c0_2 = arith.constant 0 : index
    %3 = vector.load %arg2[%c0, %c0_1, %c0_2] : memref<8x8x60xbf16, #tpu.memory_space<vmem>>, vector<8x8x60xbf16>
    %4 = vector.shape_cast %3 : vector<8x8x60xbf16> to vector<64x60xbf16>
    %c0_3 = arith.constant 0 : index
    %c0_4 = arith.constant 0 : index
    %5 = vector.load %arg4[%c0_3, %c0_4] : memref<60x448xbf16, #tpu.memory_space<vmem>>, vector<60x448xbf16>
    %cst = arith.constant dense<0.000000e+00> : vector<64x448xf32>
    %6 = tpu.matmul %4, %5, %cst {dimension_numbers = #tpu.dot_dimension_numbers<[1], [0], [0], [1], [0, 0, 1, 1], [], []>} : vector<64x60xbf16>, vector<60x448xbf16>, vector<64x448xf32> -> vector<64x448xf32>
    %c0_5 = arith.constant 0 : index
    %c0_6 = arith.constant 0 : index
    %7 = vector.load %arg5[%c0_5, %c0_6] : memref<1x448xf32, #tpu.memory_space<vmem>>, vector<1x448xf32>
    %8 = vector.broadcast %7 : vector<1x448xf32> to vector<64x448xf32>
    %9 = arith.addf %6, %8 : vector<64x448xf32>
    %cst_7 = arith.constant 0.000000e+00 : f32
    %10 = vector.broadcast %cst_7 : f32 to vector<64x448xf32>
    %11 = arith.maximumf %9, %10 : vector<64x448xf32>
    %12 = vector.shape_cast %11 : vector<64x448xf32> to vector<8x8x448xf32>
    %c0_8 = arith.constant 0 : index
    %c0_9 = arith.constant 0 : index
    %13 = vector.load %arg16[%c0_8, %c0_9] : memref<8x448xf32, #tpu.memory_space<vmem>>, vector<8x448xf32>
    %cst_10 = arith.constant dense<0.000000e+00> : vector<8x448xf32>
    %14 = vector.multi_reduction <add>, %12, %cst_10 [1] : vector<8x8x448xf32> to vector<8x448xf32>
    %15 = arith.addf %13, %14 : vector<8x448xf32>
    %c0_11 = arith.constant 0 : index
    %c0_12 = arith.constant 0 : index
    %16 = vector.load %arg16[%c0_11, %c0_12] : memref<8x448xf32, #tpu.memory_space<vmem>>, vector<8x448xf32>
    tpu.vector_store %arg16[%c0_11, %c0_12], %15 {strides = array<i32>} : memref<8x448xf32, #tpu.memory_space<vmem>>, vector<8x448xf32>,
    %c0_i32_13 = arith.constant 0 : i32
    %17 = arith.cmpi eq, %arg1, %c0_i32_13 : i32
    %18 = arith.extui %17 : i1 to i32
    %c0_i32_14 = arith.constant 0 : i32
    %19 = arith.cmpi ne, %18, %c0_i32_14 : i32
    scf.if %19 {
      %c0_15 = arith.constant 0 : index
      %c0_16 = arith.constant 0 : index
      %20 = vector.load %arg16[%c0_15, %c0_16] : memref<8x448xf32, #tpu.memory_space<vmem>>, vector<8x448xf32>
      %cst_17 = arith.constant 1.250000e-01 : f32
      %21 = vector.broadcast %cst_17 : f32 to vector<8x448xf32>
      %22 = arith.mulf %20, %21 : vector<8x448xf32>
      %c0_18 = arith.constant 0 : index
      %c0_19 = arith.constant 0 : index
      %23 = vector.load %arg3[%c0_18, %c0_19] : memref<8x32xbf16, #tpu.memory_space<vmem>>, vector<8x32xbf16>
      %c0_20 = arith.constant 0 : index
      %c0_21 = arith.constant 0 : index
      %24 = vector.load %arg6[%c0_20, %c0_21] : memref<32x576xbf16, #tpu.memory_space<vmem>>, vector<32x576xbf16>
      %cst_22 = arith.constant dense<0.000000e+00> : vector<8x576xf32>
      %25 = tpu.matmul %23, %24, %cst_22 {dimension_numbers = #tpu.dot_dimension_numbers<[1], [0], [0], [1], [0, 0, 1, 1], [], []>} : vector<8x32xbf16>, vector<32x576xbf16>, vector<8x576xf32> -> vector<8x576xf32>
      %c0_23 = arith.constant 0 : index
      %c0_24 = arith.constant 0 : index
      %26 = vector.load %arg7[%c0_23, %c0_24] : memref<1x576xf32, #tpu.memory_space<vmem>>, vector<1x576xf32>
      %27 = vector.broadcast %26 : vector<1x576xf32> to vector<8x576xf32>
      %28 = arith.addf %25, %27 : vector<8x576xf32>
      %29 = arith.truncf %28 : vector<8x576xf32> to vector<8x576xbf16>
      %c0_25 = arith.constant 0 : index
      %c0_26 = arith.constant 0 : index
      %30 = vector.load %arg8[%c0_25, %c0_26] : memref<576x512xbf16, #tpu.memory_space<vmem>>, vector<576x512xbf16>
      %cst_27 = arith.constant dense<0.000000e+00> : vector<8x512xf32>
      %31 = tpu.matmul %29, %30, %cst_27 {dimension_numbers = #tpu.dot_dimension_numbers<[1], [0], [0], [1], [0, 0, 1, 1], [], []>} : vector<8x576xbf16>, vector<576x512xbf16>, vector<8x512xf32> -> vector<8x512xf32>
      %32 = arith.truncf %22 : vector<8x448xf32> to vector<8x448xbf16>
      %c0_28 = arith.constant 0 : index
      %c0_29 = arith.constant 0 : index
      %33 = vector.load %arg9[%c0_28, %c0_29] : memref<448x512xbf16, #tpu.memory_space<vmem>>, vector<448x512xbf16>
      %cst_30 = arith.constant dense<0.000000e+00> : vector<8x512xf32>
      %34 = tpu.matmul %32, %33, %cst_30 {dimension_numbers = #tpu.dot_dimension_numbers<[1], [0], [0], [1], [0, 0, 1, 1], [], []>} : vector<8x448xbf16>, vector<448x512xbf16>, vector<8x512xf32> -> vector<8x512xf32>
      %35 = arith.addf %31, %34 : vector<8x512xf32>
      %c0_31 = arith.constant 0 : index
      %c0_32 = arith.constant 0 : index
      %36 = vector.load %arg10[%c0_31, %c0_32] : memref<1x512xf32, #tpu.memory_space<vmem>>, vector<1x512xf32>
      %37 = vector.broadcast %36 : vector<1x512xf32> to vector<8x512xf32>
      %38 = arith.addf %35, %37 : vector<8x512xf32>
      %cst_33 = arith.constant 0.000000e+00 : f32
      %39 = vector.broadcast %cst_33 : f32 to vector<8x512xf32>
      %40 = arith.maximumf %38, %39 : vector<8x512xf32>
      %41 = arith.truncf %40 : vector<8x512xf32> to vector<8x512xbf16>
      %c0_34 = arith.constant 0 : index
      %c0_35 = arith.constant 0 : index
      %42 = vector.load %arg11[%c0_34, %c0_35] : memref<512x256xbf16, #tpu.memory_space<vmem>>, vector<512x256xbf16>
      %cst_36 = arith.constant dense<0.000000e+00> : vector<8x256xf32>
      %43 = tpu.matmul %41, %42, %cst_36 {dimension_numbers = #tpu.dot_dimension_numbers<[1], [0], [0], [1], [0, 0, 1, 1], [], []>} : vector<8x512xbf16>, vector<512x256xbf16>, vector<8x256xf32> -> vector<8x256xf32>
      %c0_37 = arith.constant 0 : index
      %c0_38 = arith.constant 0 : index
      %44 = vector.load %arg12[%c0_37, %c0_38] : memref<1x256xf32, #tpu.memory_space<vmem>>, vector<1x256xf32>
      %45 = vector.broadcast %44 : vector<1x256xf32> to vector<8x256xf32>
      %46 = arith.addf %43, %45 : vector<8x256xf32>
      %cst_39 = arith.constant 0.000000e+00 : f32
      %47 = vector.broadcast %cst_39 : f32 to vector<8x256xf32>
      %48 = arith.maximumf %46, %47 : vector<8x256xf32>
      %49 = arith.truncf %48 : vector<8x256xf32> to vector<8x256xbf16>
      %c0_40 = arith.constant 0 : index
      %c0_41 = arith.constant 0 : index
      %50 = vector.load %arg13[%c0_40, %c0_41] : memref<256x128xbf16, #tpu.memory_space<vmem>>, vector<256x128xbf16>
      %cst_42 = arith.constant dense<0.000000e+00> : vector<8x128xf32>
      %51 = tpu.matmul %49, %50, %cst_42 {dimension_numbers = #tpu.dot_dimension_numbers<[1], [0], [0], [1], [0, 0, 1, 1], [], []>} : vector<8x256xbf16>, vector<256x128xbf16>, vector<8x128xf32> -> vector<8x128xf32>
      %c0_43 = arith.constant 0 : index
      %c0_44 = arith.constant 0 : index
      %52 = vector.load %arg14[%c0_43, %c0_44] : memref<1x128xf32, #tpu.memory_space<vmem>>, vector<1x128xf32>
      %53 = vector.broadcast %52 : vector<1x128xf32> to vector<8x128xf32>
      %54 = arith.addf %51, %53 : vector<8x128xf32>
      %c0_45 = arith.constant 0 : index
      %c0_46 = arith.constant 0 : index
      %55 = vector.load %arg15[%c0_45, %c0_46] : memref<8x128xf32, #tpu.memory_space<vmem>>, vector<8x128xf32>
      tpu.vector_store %arg15[%c0_45, %c0_46], %54 {strides = array<i32>} : memref<8x128xf32, #tpu.memory_space<vmem>>, vector<8x128xf32>,
    } else {
    }
    return
  }
  func.func @transform_0(%arg0: i32, %arg1: i32) -> (i32, i32, i32) {
    %c0_i32 = arith.constant 0 : i32
    %c0_i32_0 = arith.constant 0 : i32
    return %arg0, %arg1, %c0_i32 : i32, i32, i32
  }
  func.func @transform_1(%arg0: i32, %arg1: i32) -> (i32, i32) {
    %c0_i32 = arith.constant 0 : i32
    %c0_i32_0 = arith.constant 0 : i32
    return %arg0, %c0_i32 : i32, i32
  }
  func.func @transform_2(%arg0: i32, %arg1: i32) -> (i32, i32) {
    %c0_i32 = arith.constant 0 : i32
    %c0_i32_0 = arith.constant 0 : i32
    %c0_i32_1 = arith.constant 0 : i32
    return %c0_i32, %c0_i32_0 : i32, i32
  }
  func.func @transform_3(%arg0: i32, %arg1: i32) -> (i32, i32) {
    %c0_i32 = arith.constant 0 : i32
    %c0_i32_0 = arith.constant 0 : i32
    %c0_i32_1 = arith.constant 0 : i32
    return %c0_i32, %c0_i32_0 : i32, i32
  }
  func.func @transform_4(%arg0: i32, %arg1: i32) -> (i32, i32) {
    %c0_i32 = arith.constant 0 : i32
    %c0_i32_0 = arith.constant 0 : i32
    %c0_i32_1 = arith.constant 0 : i32
    return %c0_i32, %c0_i32_0 : i32, i32
  }
  func.func @transform_5(%arg0: i32, %arg1: i32) -> (i32, i32) {
    %c0_i32 = arith.constant 0 : i32
    %c0_i32_0 = arith.constant 0 : i32
    %c0_i32_1 = arith.constant 0 : i32
    return %c0_i32, %c0_i32_0 : i32, i32
  }
  func.func @transform_6(%arg0: i32, %arg1: i32) -> (i32, i32) {
    %c0_i32 = arith.constant 0 : i32
    %c0_i32_0 = arith.constant 0 : i32
    %c0_i32_1 = arith.constant 0 : i32
    return %c0_i32, %c0_i32_0 : i32, i32
  }
  func.func @transform_7(%arg0: i32, %arg1: i32) -> (i32, i32) {
    %c0_i32 = arith.constant 0 : i32
    %c0_i32_0 = arith.constant 0 : i32
    %c0_i32_1 = arith.constant 0 : i32
    return %c0_i32, %c0_i32_0 : i32, i32
  }
  func.func @transform_8(%arg0: i32, %arg1: i32) -> (i32, i32) {
    %c0_i32 = arith.constant 0 : i32
    %c0_i32_0 = arith.constant 0 : i32
    %c0_i32_1 = arith.constant 0 : i32
    return %c0_i32, %c0_i32_0 : i32, i32
  }
  func.func @transform_9(%arg0: i32, %arg1: i32) -> (i32, i32) {
    %c0_i32 = arith.constant 0 : i32
    %c0_i32_0 = arith.constant 0 : i32
    %c0_i32_1 = arith.constant 0 : i32
    return %c0_i32, %c0_i32_0 : i32, i32
  }
  func.func @transform_10(%arg0: i32, %arg1: i32) -> (i32, i32) {
    %c0_i32 = arith.constant 0 : i32
    %c0_i32_0 = arith.constant 0 : i32
    %c0_i32_1 = arith.constant 0 : i32
    return %c0_i32, %c0_i32_0 : i32, i32
  }
  func.func @transform_11(%arg0: i32, %arg1: i32) -> (i32, i32) {
    %c0_i32 = arith.constant 0 : i32
    %c0_i32_0 = arith.constant 0 : i32
    %c0_i32_1 = arith.constant 0 : i32
    return %c0_i32, %c0_i32_0 : i32, i32
  }
  func.func @transform_12(%arg0: i32, %arg1: i32) -> (i32, i32) {
    %c0_i32 = arith.constant 0 : i32
    %c0_i32_0 = arith.constant 0 : i32
    %c0_i32_1 = arith.constant 0 : i32
    return %c0_i32, %c0_i32_0 : i32, i32
  }
  func.func @transform_13(%arg0: i32, %arg1: i32) -> (i32, i32) {
    %c0_i32 = arith.constant 0 : i32
    %c0_i32_0 = arith.constant 0 : i32
    return %arg0, %c0_i32 : i32, i32
  }
}

</mosaic_0001>

<bundles_post_ra>
// kernel: tpu_custom_call.1
= control target key start
LH: loop header
LB: loop body
LE: loop exit
PB: predicated region body
PF: predicated region fallthrough
CT: control target
= control target key end

     0   :  { %18 = vsyncpa [#allocation4], 0  ;;  %s5345_s0 = inlined_call_operand.hbm [shape: bf16[8,8,60], index: 0, kind: input, shape index: {}]   ;;  %s5346_s1 = inlined_call_operand.hbm [shape: bf16[8,32], index: 1, kind: input, shape index: {}]   ;;  %s5347_s2 = inlined_call_operand.hbm [shape: bf16[60,448], index: 2, kind: input, shape index: {}]   ;;  %s5348_s3 = inlined_call_operand.vmem [shape: f32[1,448], index: 3, kind: input, shape index: {}]   ;;  %s5349_s4 = inlined_call_operand.hbm [shape: bf16[32,576], index: 4, kind: input, shape index: {}]   ;;  %s5350_s5 = inlined_call_operand.vmem [shape: f32[1,576], index: 5, kind: input, shape index: {}]   ;;  %s5351_s6 = inlined_call_operand.hbm [shape: bf16[576,512], index: 6, kind: input, shape index: {}]   ;;  %s5352_s7 = inlined_call_operand.hbm [shape: bf16[448,512], index: 7, kind: input, shape index: {}]   ;;  %s5353_s8 = inlined_call_operand.vmem [shape: f32[1,512], index: 8, kind: input, shape index: {}]   ;;  %s5354_s9 = inlined_call_operand.hbm [shape: bf16[512,256], index: 9, kind: input, shape index: {}]   ;;  %s5355_s10 = inlined_call_operand.vmem [shape: f32[1,256], index: 10, kind: input, shape index: {}]   ;;  %s5356_s11 = inlined_call_operand.hbm [shape: bf16[256,128], index: 11, kind: input, shape index: {}]   ;;  %s5357_s12 = inlined_call_operand.vmem [shape: f32[1,128], index: 12, kind: input, shape index: {}]   ;;  %s5358_s13 = inlined_call_operand.hbm [shape: f32[8,128], index: 13, kind: output, shape index: {}]  }
   0x1   :  { %19 = vsyncpa [#allocation7], 0 }
   0x2   :  { %20 = vsyncpa [#allocation10], 0 }
   0x3   :  { %21 = vsyncpa [#allocation13], 0 }
   0x4   :  { %22 = vsyncpa [#allocation16], 0 }
   0x5   :  { %23 = vsyncpa [#allocation5], 0  ;;  %s4884_s25 = smov [#allocation6]   ;;  %s4885_s27 = smov [#allocation9]  }
   0x6   :  { %s42_s26 = sshll.u32 %s4884_s25, 4  ;;  %s65_s28 = sshll.u32 %s4885_s27, 4  ;;  %s43_s26 = int_to_ptr.vmem [resolvable:$true] %s42_s26  ;;  %s4974_s28 = int_to_ptr.vmem [resolvable:$true] %s65_s28 }
   0x7   :  { %s4674_s14 = scalar_lea.hbm %s5346_s1, 64 }
   0x8   :  { %p4675_p0 = scmp.ne.s32.totalorder %s5346_s1, %s4674_s14  ;;  %p4678_p1 = scmp.lt.u32.totalorder %s4674_s14, %s5346_s1 }
   0xa   :  { %p4680_p2 = pnand %p4678_p1, %p4675_p0 }
   0xc   :  { %4683 = shalt.err (!%p4680_p2)
}
   0xd   :  { %s4684_s19 = scalar_lea.vmem %s43_s26, 64  ;;  %p4689_p4 = scmp.lt.s32.totalorder %s43_s26, %s43_s26 }
   0xe   :  { %p4685_p3 = scmp.ne.s32.totalorder %s43_s26, %s4684_s19  ;;  %p4690_p5 = scmp.lt.s32.totalorder %s4684_s19, %s4684_s19 }
  0x10   :  { %p4691_p6 = por %p4690_p5, %p4689_p4 }
  0x12   :  { %p4692_p7 = pnand %p4691_p6, %p4685_p3 }
  0x14   :  { %4695 = shalt.err (!%p4692_p7)
}
  0x15   :  { %45 = dma.hbm_to_vmem [thread:$0]  %s5346_s1, 64, %s43_s26, [#allocation7]  }
  0x16   :  { %s4696_s24 = scalar_lea.hbm %s5349_s4, 1280 }
  0x17   :  { %p4697_p8 = scmp.ne.s32.totalorder %s5349_s4, %s4696_s24  ;;  %p4700_p9 = scmp.lt.u32.totalorder %s4696_s24, %s5349_s4 }
  0x19   :  { %p4702_p10 = pnand %p4700_p9, %p4697_p8 }
  0x1b   :  { %4705 = shalt.err (!%p4702_p10)
}
  0x1c   :  { %s4706_s14 = scalar_lea.vmem %s4974_s28, 1280  ;;  %p4711_p12 = scmp.lt.s32.totalorder %s4974_s28, %s4974_s28 }
  0x1d   :  { %p4707_p11 = scmp.ne.s32.totalorder %s4974_s28, %s4706_s14  ;;  %p4712_p13 = scmp.lt.s32.totalorder %s4706_s14, %s4706_s14 }
  0x1f   :  { %p4713_p0 = por %p4712_p13, %p4711_p12 }
  0x21   :  { %p4714_p1 = pnand %p4713_p0, %p4707_p11 }
  0x23   :  { %4717 = shalt.err (!%p4714_p1)
}
  0x24   :  { %s4886_s1 = smov 320   ;;  %s4887_s26 = smov 20  }
  0x25   :  { %71 = dma.hbm_to_vmem [thread:$0]  %s5349_s4, 1280, %s4974_s28, [#allocation10], %s4886_s1, %s4886_s1, %s4887_s26  }
  0x26   :  { %s4888_s17 = smov [#allocation12]   ;;  %s4889_s19 = smov [#allocation3]  }
  0x27   :  { %s91_s18 = sshll.u32 %s4888_s17, 4  ;;  %s29_s20 = sshll.u32 %s4889_s19, 4  ;;  %s92_s18 = int_to_ptr.vmem [resolvable:$true] %s91_s18  ;;  %s5005_s20 = int_to_ptr.vmem [resolvable:$true] %s29_s20 }
  0x28   :  { %s4718_s23 = scalar_lea.hbm %s5352_s7, 14336 }
  0x29   :  { %p4719_p2 = scmp.ne.s32.totalorder %s5352_s7, %s4718_s23  ;;  %p4722_p3 = scmp.lt.u32.totalorder %s4718_s23, %s5352_s7 }
  0x2b   :  { %p4724_p4 = pnand %p4722_p3, %p4719_p2 }
  0x2d   :  { %4727 = shalt.err (!%p4724_p4)
}
  0x2e   :  { %s4728_s4 = scalar_lea.vmem %s92_s18, 14336  ;;  %p4733_p6 = scmp.lt.s32.totalorder %s92_s18, %s92_s18 }
  0x2f   :  { %p4729_p5 = scmp.ne.s32.totalorder %s92_s18, %s4728_s4  ;;  %p4734_p7 = scmp.lt.s32.totalorder %s4728_s4, %s4728_s4 }
  0x31   :  { %p4735_p8 = por %p4734_p7, %p4733_p6 }
  0x33   :  { %p4736_p9 = pnand %p4735_p8, %p4729_p5 }
  0x35   :  { %4739 = shalt.err (!%p4736_p9)
}
  0x36   :  { %s4890_s28 = smov 256   ;;  %s4891_s30 = smov 16  }
  0x37   :  { %97 = dma.hbm_to_vmem [thread:$0]  %s5352_s7, 14336, %s92_s18, [#allocation13], %s4890_s28, %s4890_s28, %s4891_s30  }
  0x38   :  { %s4740_s16 = scalar_lea.hbm %s5345_s0, 512 }
  0x39   :  { %p4741_p10 = scmp.ne.s32.totalorder %s5345_s0, %s4740_s16  ;;  %p4744_p11 = scmp.lt.u32.totalorder %s4740_s16, %s5345_s0 }
  0x3b   :  { %p4746_p12 = pnand %p4744_p11, %p4741_p10 }
  0x3d   :  { %4749 = shalt.err (!%p4746_p12)
}
  0x3e   :  { %s4750_s23 = scalar_lea.vmem %s5005_s20, 512  ;;  %p4755_p0 = scmp.lt.s32.totalorder %s5005_s20, %s5005_s20 }
  0x3f   :  { %p4751_p13 = scmp.ne.s32.totalorder %s5005_s20, %s4750_s23  ;;  %p4756_p1 = scmp.lt.s32.totalorder %s4750_s23, %s4750_s23 }
  0x41   :  { %p4757_p2 = por %p4756_p1, %p4755_p0 }
  0x43   :  { %p4758_p3 = pnand %p4757_p2, %p4751_p13 }
  0x45   :  { %4761 = shalt.err (!%p4758_p3)
}
  0x46   :  { %s4892_s7 = smov 64   ;;  %s4893_s18 = smov 4  }
  0x47   :  { %35 = dma.hbm_to_vmem [thread:$0]  %s5345_s0, 512, %s5005_s20, [#allocation4], %s4892_s7, %s4892_s7, %s4893_s18  }
  0x48   :  { %s4894_s27 = smov [#allocation8]   ;;  %s4895_s4 = smov [#allocation11]  }
  0x49   :  { %s51_s29 = sshll.u32 %s4894_s27, 4  ;;  %s79_s14 = sshll.u32 %s4895_s4, 4  ;;  %s52_s29 = int_to_ptr.vmem [resolvable:$true] %s51_s29  ;;  %s5042_s14 = int_to_ptr.vmem [resolvable:$true] %s79_s14 }
  0x4a   :  { %s4762_s15 = scalar_lea.hbm %s5347_s2, 2048 }
  0x4b   :  { %p4763_p4 = scmp.ne.s32.totalorder %s5347_s2, %s4762_s15  ;;  %p4766_p5 = scmp.lt.u32.totalorder %s4762_s15, %s5347_s2 }
  0x4d   :  { %p4768_p6 = pnand %p4766_p5, %p4763_p4 }
  0x4f   :  { %4771 = shalt.err (!%p4768_p6)
}
  0x50   :  { %s4772_s0 = scalar_lea.vmem %s52_s29, 2048  ;;  %p4777_p8 = scmp.lt.s32.totalorder %s52_s29, %s52_s29 }
  0x51   :  { %p4773_p7 = scmp.ne.s32.totalorder %s52_s29, %s4772_s0  ;;  %p4778_p9 = scmp.lt.s32.totalorder %s4772_s0, %s4772_s0 }
  0x53   :  { %p4779_p10 = por %p4778_p9, %p4777_p8 }
  0x55   :  { %p4780_p11 = pnand %p4779_p10, %p4773_p7 }
  0x57   :  { %4783 = shalt.err (!%p4780_p11)
}
  0x58   :  { %57 = dma.hbm_to_vmem [thread:$0]  %s5347_s2, 2048, %s52_s29, [#allocation7], %s4890_s28, %s4890_s28, %s4891_s30  }
  0x59   :  { %s4784_s25 = scalar_lea.hbm %s5351_s6, 18432 }
  0x5a   :  { %p4785_p12 = scmp.ne.s32.totalorder %s5351_s6, %s4784_s25  ;;  %p4788_p13 = scmp.lt.u32.totalorder %s4784_s25, %s5351_s6 }
  0x5c   :  { %p4790_p0 = pnand %p4788_p13, %p4785_p12 }
  0x5e   :  { %4793 = shalt.err (!%p4790_p0)
}
  0x5f   :  { %s4794_s15 = scalar_lea.vmem %s5042_s14, 18432  ;;  %p4799_p2 = scmp.lt.s32.totalorder %s5042_s14, %s5042_s14 }
  0x60   :  { %p4795_p1 = scmp.ne.s32.totalorder %s5042_s14, %s4794_s15  ;;  %p4800_p3 = scmp.lt.s32.totalorder %s4794_s15, %s4794_s15 }
  0x62   :  { %p4801_p4 = por %p4800_p3, %p4799_p2 }
  0x64   :  { %p4802_p5 = pnand %p4801_p4, %p4795_p1 }
  0x66   :  { %4805 = shalt.err (!%p4802_p5)
}
  0x67   :  { %85 = dma.hbm_to_vmem [thread:$0]  %s5351_s6, 18432, %s5042_s14, [#allocation10], %s4890_s28, %s4890_s28, %s4891_s30  }
  0x68   :  { %s4896_s16 = smov [#allocation14]   ;;  %s4806_s0 = scalar_lea.hbm %s5354_s9, 8192 }
  0x69   :  { %s105_s17 = sshll.u32 %s4896_s16, 4  ;;  %p4807_p6 = scmp.ne.s32.totalorder %s5354_s9, %s4806_s0  ;;  %s106_s17 = int_to_ptr.vmem [resolvable:$true] %s105_s17 }
  0x6a   :  { %p4810_p7 = scmp.lt.u32.totalorder %s4806_s0, %s5354_s9 }
  0x6c   :  { %p4812_p8 = pnand %p4810_p7, %p4807_p6 }
  0x6e   :  { %4815 = shalt.err (!%p4812_p8)
}
  0x6f   :  { %s4816_s25 = scalar_lea.vmem %s106_s17, 8192  ;;  %p4821_p10 = scmp.lt.s32.totalorder %s106_s17, %s106_s17 }
  0x70   :  { %p4817_p9 = scmp.ne.s32.totalorder %s106_s17, %s4816_s25  ;;  %p4822_p11 = scmp.lt.s32.totalorder %s4816_s25, %s4816_s25 }
  0x72   :  { %p4823_p12 = por %p4822_p11, %p4821_p10 }
  0x74   :  { %p4824_p13 = pnand %p4823_p12, %p4817_p9 }
  0x76   :  { %4827 = shalt.err (!%p4824_p13)
}
  0x77   :  { %s4897_s6 = smov 128   ;;  %s4898_s28 = smov 8  }
  0x78   :  { %111 = dma.hbm_to_vmem [thread:$0]  %s5354_s9, 8192, %s106_s17, [#allocation13], %s4897_s6, %s4897_s6, %s4898_s28  }
  0x79   :  { %s4899_s27 = smov [#allocation15]   ;;  %s4828_s15 = scalar_lea.hbm %s5356_s11, 2048 }
  0x7a   :  { %s119_s4 = sshll.u32 %s4899_s27, 4  ;;  %p4829_p0 = scmp.ne.s32.totalorder %s5356_s11, %s4828_s15  ;;  %s120_s4 = int_to_ptr.vmem [resolvable:$true] %s119_s4 }
  0x7b   :  { %p4832_p1 = scmp.lt.u32.totalorder %s4828_s15, %s5356_s11 }
  0x7d   :  { %p4834_p2 = pnand %p4832_p1, %p4829_p0 }
  0x7f   :  { %4837 = shalt.err (!%p4834_p2)
}
  0x80   :  { %s4838_s21 = scalar_lea.vmem %s120_s4, 2048  ;;  %p4843_p4 = scmp.lt.s32.totalorder %s120_s4, %s120_s4 }
  0x81   :  { %p4839_p3 = scmp.ne.s32.totalorder %s120_s4, %s4838_s21  ;;  %p4844_p5 = scmp.lt.s32.totalorder %s4838_s21, %s4838_s21 }
  0x83   :  { %p4845_p6 = por %p4844_p5, %p4843_p4 }
  0x85   :  { %p4846_p7 = pnand %p4845_p6, %p4839_p3 }
  0x87   :  { %4849 = shalt.err (!%p4846_p7)
}
  0x88   :  { %125 = dma.hbm_to_vmem [thread:$0]  %s5356_s11, 2048, %s120_s4, [#allocation16], %s4892_s7, %s4892_s7, %s4893_s18  }
  0x89   :  { %4872 = dma.done.wait [#allocation4], 512  }
  0x8a   :  { %4873 = vsyncadd [#allocation4], 4294966784 }
  0x8b   :  { %4874 = dma.done.wait [#allocation7], 2112  }
  0x8c   :  { %4875 = vsyncadd [#allocation7], 4294965184 }
  0x8d   :  { %4876 = dma.done.wait [#allocation10], 19712  }
  0x8e   :  { %4877 = vsyncadd [#allocation10], 4294947584 }
  0x8f   :  { %4878 = dma.done.wait [#allocation13], 22528  }
  0x90   :  { %4879 = vsyncadd [#allocation13], 4294944768 }
  0x91   :  { %4880 = dma.done.wait [#allocation16], 2048  }
  0x92   :  { %4881 = vsyncadd [#allocation16], 4294965248  ;;  %v4900_v0 = vmov 0   ;;  %vm160_vm0 = vcmask 523264   ;;  %v4901_v1 = vmov 0.0   ;;  %vm317_vm1 = vcmask 1045504  }
  0x93   :  { %362 = vmatprep.mubr.bf16.mxu0 %v4900_v0  ;;  %161 = vst.msk [vmem:[#allocation2 + $0x18] sm:$0xff] %vm160_vm0, %v4901_v1  ;;  %v4136_v2 = vld [vmem:[#allocation8 + $0x4] ss:$16 sps:$4 sm:$0xff]   ;;  %v4138_v3 = vld [vmem:[#allocation8] ss:$16 sps:$4 sm:$0xff]   ;;  %vm304_vm2 = vcmask 490496  }
  0x94   :  { %330 = vmatprep.subr.bf16.mxu0 %v4136_v2  ;;  %v4139_v4 = vld [vmem:[#allocation8 + $0x24] ss:$16 sps:$4 sm:$0xff]   ;;  %v4141_v5 = vld [vmem:[#allocation8 + $0x20] ss:$16 sps:$4 sm:$0xff]   ;;  %v4151_v11 = vld [vmem:[#allocation8 + $0xc] ss:$16 sps:$4 sm:$0xff]  }
  0x95   :  { %331 = vmatpush1.bf16.msra.mxu0 %v4138_v3  ;;  %v4142_v6 = vld [vmem:[#allocation8 + $0x44] ss:$16 sps:$4 sm:$0xff]   ;;  %v4144_v7 = vld [vmem:[#allocation8 + $0x40] ss:$16 sps:$4 sm:$0xff]   ;;  %v4149_v13 = vld [vmem:[#allocation8 + $0x8] ss:$16 sps:$4 sm:$0xff]  }
  0x96   :  { %332 = vmatprep.subr.bf16.mxu0 %v4139_v4  ;;  %v4145_v8 = vld [vmem:[#allocation8 + $0x64] ss:$16 sps:$4 sm:$0x3f]   ;;  %v4147_v9 = vld [vmem:[#allocation8 + $0x60] ss:$16 sps:$4 sm:$0x3f]  }
  0x97   :  { %v319_v10 = vsel %vm317_vm1, %v4147_v9, 0  ;;  %v4148_v12 = vld [vmem:[#allocation3] sm:$0xff]   ;;  %v4153_v15 = vld [vmem:[#allocation8 + $0x28] ss:$16 sps:$4 sm:$0xff]   ;;  %v4178_v21 = vld [vmem:[#allocation12 + $0x4] ss:$16 sps:$4 sm:$0xff]  }
  0x98   :  { %v4155_v14 = vld [vmem:[#allocation8 + $0x2c] ss:$16 sps:$4 sm:$0xff]   ;;  %v4152_v16 = vld [vmem:[#allocation3 + $0x8] sm:$0xff]   ;;  %v4180_v22 = vld [vmem:[#allocation12] ss:$16 sps:$4 sm:$0xff]   ;;  %1849 = vmatprep.subr.bf16.mxu1 %v4178_v21  ;;  %vm895_vm3 = vcmask 261120  }
  0x99   :  { %333 = vmatpush1.bf16.msra.mxu0 %v4141_v5  ;;  %v4159_v17 = vld [vmem:[#allocation8 + $0x4c] ss:$16 sps:$4 sm:$0xff]   ;;  %v4157_v18 = vld [vmem:[#allocation8 + $0x48] ss:$16 sps:$4 sm:$0xff]   ;;  %v4181_v23 = vld [vmem:[#allocation12 + $0x24] ss:$16 sps:$4 sm:$0xff]   ;;  %1850 = vmatpush1.bf16.msra.mxu1 %v4180_v22 }
  0x9a   :  { %334 = vmatprep.subr.bf16.mxu0 %v4142_v6  ;;  %v4161_v19 = vld [vmem:[#allocation8 + $0x6c] ss:$16 sps:$4 sm:$0x3f]   ;;  %v4163_v20 = vld [vmem:[#allocation8 + $0x68] ss:$16 sps:$4 sm:$0x3f]   ;;  %1851 = vmatprep.subr.bf16.mxu1 %v4181_v23 }
  0x9b   :  { %v4166_v24 = vld [vmem:[#allocation9 + $0x4] ss:$20 sps:$4 sm:$0xff]   ;;  %v4156_v25 = vld [vmem:[#allocation3 + $0x10] sm:$0xff]   ;;  %v325_v26 = vsel %vm317_vm1, %v4163_v20, 0  ;;  %v4164_v28 = vld [vmem:[#allocation9] ss:$20 sps:$4 sm:$0xff]  }
  0x9c   :  { %v4160_v27 = vld [vmem:[#allocation3 + $0x18] sm:$0xff]   ;;  %v4169_v29 = vld [vmem:[#allocation9 + $0x2c] ss:$20 sps:$4 sm:$0xff]   ;;  %v4167_v30 = vld [vmem:[#allocation9 + $0x28] ss:$20 sps:$4 sm:$0xff]   ;;  %vm4902_vm4 = vmmov 0  }
  0x9d   :  { %335 = vmatpush1.bf16.msra.mxu0 %v4144_v7  ;;  %v4172_v31 = vld [vmem:[#allocation9 + $0xc] ss:$20 sps:$4 sm:$0xff]   ;;  %v803_v32 = vld [vmem:[#allocation6] sm:$0xf]  ;;  %v4175_v34 = vld [vmem:[#allocation9 + $0x34] ss:$20 sps:$4 sm:$0xff]  }
  0x9e   :  { %3713 = vmatprep.subr.msk.bf16.mxu0 %vm317_vm1, %v4145_v8  ;;  %v4170_v33 = vld [vmem:[#allocation9 + $0x8] ss:$20 sps:$4 sm:$0xff]   ;;  %v4173_v35 = vld [vmem:[#allocation9 + $0x30] ss:$20 sps:$4 sm:$0xff]   ;;  %v4177_v37 = vld [vmem:[#allocation9 + $0x38] ss:$20 sps:$4 sm:$0xff]  }
  0x9f   :  { %v4176_v36 = vld [vmem:[#allocation9 + $0x10] ss:$20 sps:$4 sm:$0xff]   ;;  %vm745_vm5 = vcmask 1041409   ;;  %vm747_vm6 = vcmask 1042434   ;;  %vm749_vm7 = vcmask 1043459   ;;  %vm751_vm8 = vcmask 1044484  }
  0xa0   :  { %v4183_v38 = vld [vmem:[#allocation12 + $0x20] ss:$16 sps:$4 sm:$0xff]   ;;  %v4184_v39 = vld [vmem:[#allocation12 + $0x44] ss:$16 sps:$4 sm:$0xff]   ;;  %vm753_vm9 = vcmask 1045509   ;;  %vm755_vm10 = vcmask 1046534  }
  0xa1   :  { %337 = vmatpush1.bf16.msra.mxu0 %v319_v10  ;;  %1852 = vmatpush1.bf16.msra.mxu1 %v4183_v38  ;;  %v4186_v40 = vld [vmem:[#allocation12 + $0x40] ss:$16 sps:$4 sm:$0xff]   ;;  %v4187_v41 = vld [vmem:[#allocation12 + $0x64] ss:$16 sps:$4 sm:$0xff]   ;;  %vm757_vm11 = vcmask 1047559  }
  0xa2   :  { %403 = vmatprep.subr.bf16.mxu0 %v4151_v11  ;;  %1853 = vmatprep.subr.bf16.mxu1 %v4184_v39  ;;  %v4189_v42 = vld [vmem:[#allocation12 + $0x60] ss:$16 sps:$4 sm:$0xff]   ;;  %v4190_v43 = vld [vmem:[#allocation12 + $0x84] ss:$16 sps:$4 sm:$0xff]  }
  0xa3   :  { %v4192_v44 = vld [vmem:[#allocation12 + $0x80] ss:$16 sps:$4 sm:$0xff]   ;;  %v4193_v45 = vld [vmem:[#allocation12 + $0xa4] ss:$16 sps:$4 sm:$0xff]  }
  0xa4   :  { %3714 = vmatmul.mubr.msk.bf16.vlgmr.msra.gmra.mrb[0].mxu0 %vm304_vm2, %v4148_v12  ;;  %v4195_v46 = vld [vmem:[#allocation12 + $0xa0] ss:$16 sps:$4 sm:$0xff]   ;;  %v4196_v47 = vld [vmem:[#allocation12 + $0xc4] ss:$16 sps:$4 sm:$0xff]  }
  0xa5   :  { %404 = vmatpush1.bf16.msra.mxu0 %v4149_v13  ;;  %372 = vmatprep.mubr.bf16.mxu0 %v4900_v0  ;;  %v4198_v48 = vld [vmem:[#allocation12 + $0xc0] ss:$16 sps:$4 sm:$0xff]   ;;  %v4199_v49 = vld [vmem:[#allocation12 + $0xe4] ss:$16 sps:$4 sm:$0xff]  }
  0xa6   :  { %405 = vmatprep.subr.bf16.mxu0 %v4155_v14  ;;  %1854 = vmatpush1.bf16.msra.mxu1 %v4186_v40  ;;  %v4201_v50 = vld [vmem:[#allocation12 + $0xe0] ss:$16 sps:$4 sm:$0xff]   ;;  %v4202_v51 = vld [vmem:[#allocation12 + $0x104] ss:$16 sps:$4 sm:$0xff]  }
  0xa7   :  { %1855 = vmatprep.subr.bf16.mxu1 %v4187_v41  ;;  %v4204_v52 = vld [vmem:[#allocation12 + $0x100] ss:$16 sps:$4 sm:$0xff]   ;;  %v4205_v53 = vld [vmem:[#allocation12 + $0x124] ss:$16 sps:$4 sm:$0xff]  }
  0xa8   :  { %v4207_v54 = vld [vmem:[#allocation12 + $0x120] ss:$16 sps:$4 sm:$0xff]   ;;  %v4208_v55 = vld [vmem:[#allocation12 + $0x144] ss:$16 sps:$4 sm:$0xff]  }
  0xa9   :  { %406 = vmatpush1.bf16.msra.mxu0 %v4153_v15  ;;  %v4210_v56 = vld [vmem:[#allocation12 + $0x140] ss:$16 sps:$4 sm:$0xff]   ;;  %v4211_v57 = vld [vmem:[#allocation12 + $0x164] ss:$16 sps:$4 sm:$0xff]  }
  0xaa   :  { %407 = vmatprep.subr.bf16.mxu0 %v4159_v17  ;;  %1856 = vmatpush1.bf16.msra.mxu1 %v4189_v42  ;;  %v4213_v58 = vld [vmem:[#allocation12 + $0x160] ss:$16 sps:$4 sm:$0xff]   ;;  %v4214_v59 = vld [vmem:[#allocation12 + $0x184] ss:$16 sps:$4 sm:$0xff]  }
  0xab   :  { %1857 = vmatprep.subr.bf16.mxu1 %v4190_v43  ;;  %v4216_v60 = vld [vmem:[#allocation12 + $0x180] ss:$16 sps:$4 sm:$0xff]   ;;  %v4220_v61 = vld [vmem:[#allocation12 + $0x1a4] ss:$16 sps:$4 sm:$0xff]  }
  0xac   :  { %3715 = vmatmul.mubr.msk.bf16.gmra.mrb[4].mxu0 %vm304_vm2, %v4152_v16  ;;  %v4222_v62 = vld [vmem:[#allocation12 + $0x1a0] ss:$16 sps:$4 sm:$0xff]   ;;  %v4219_v63 = vld [vmem:[#allocation12 + $0x204] ss:$16 sps:$4 sm:$0xff]  }
  0xad   :  { %382 = vmatprep.mubr.bf16.mxu0 %v4900_v0  ;;  %408 = vmatpush1.bf16.msra.mxu0 %v4157_v18  ;;  %v4226_v2 = vld [vmem:[#allocation12 + $0x1c4] ss:$16 sps:$4 sm:$0xff]   ;;  %v4228_v3 = vld [vmem:[#allocation12 + $0x1c0] ss:$16 sps:$4 sm:$0xff]  }
  0xae   :  { %3718 = vmatprep.subr.msk.bf16.mxu0 %vm317_vm1, %v4161_v19  ;;  %1858 = vmatpush1.bf16.msra.mxu1 %v4192_v44  ;;  %v4225_v4 = vld [vmem:[#allocation12 + $0x224] ss:$16 sps:$4 sm:$0xff]   ;;  %v4223_v5 = vld [vmem:[#allocation12 + $0x220] ss:$16 sps:$4 sm:$0xff]  }
  0xaf   :  { %1859 = vmatprep.subr.bf16.mxu1 %v4193_v45  ;;  %v4232_v6 = vld [vmem:[#allocation12 + $0x1e4] ss:$16 sps:$4 sm:$0xff]   ;;  %v4234_v7 = vld [vmem:[#allocation12 + $0x1e0] ss:$16 sps:$4 sm:$0xff]  }
  0xb0   :  { %v4231_v8 = vld [vmem:[#allocation12 + $0x244] ss:$16 sps:$4 sm:$0xff]   ;;  %v4229_v9 = vld [vmem:[#allocation12 + $0x240] ss:$16 sps:$4 sm:$0xff]  }
  0xb1   :  { %410 = vmatpush1.bf16.msra.mxu0 %v325_v26  ;;  %v4237_v10 = vld [vmem:[#allocation12 + $0x264] ss:$16 sps:$4 sm:$0xff]   ;;  %v4235_v11 = vld [vmem:[#allocation12 + $0x260] ss:$16 sps:$4 sm:$0xff]  }
  0xb2   :  { %899 = vmatprep.subr.bf16.mxu0 %v4166_v24  ;;  %1860 = vmatpush1.bf16.msra.mxu1 %v4195_v46  ;;  %v4243_v13 = vld [vmem:[#allocation12 + $0x284] ss:$16 sps:$4 sm:$0xff]   ;;  %v4241_v14 = vld [vmem:[#allocation12 + $0x280] ss:$16 sps:$4 sm:$0xff]  }
  0xb3   :  { %1861 = vmatprep.subr.bf16.mxu1 %v4196_v47  ;;  %v4247_v15 = vld [vmem:[#allocation12 + $0x2a0] ss:$16 sps:$4 sm:$0xff]   ;;  %v4255_v17 = vld [vmem:[#allocation12 + $0x2c4] ss:$16 sps:$4 sm:$0xff]  }
  0xb4   :  { %3716 = vmatmul.mubr.msk.bf16.gmra.mrb[8].mxu0 %vm304_vm2, %v4156_v25  ;;  %v4253_v18 = vld [vmem:[#allocation12 + $0x2c0] ss:$16 sps:$4 sm:$0xff]   ;;  %v4261_v19 = vld [vmem:[#allocation12 + $0x2e4] ss:$16 sps:$4 sm:$0xff]  }
  0xb5   :  { %392 = vmatprep.mubr.bf16.mxu0 %v4900_v0  ;;  %v4259_v20 = vld [vmem:[#allocation12 + $0x2e0] ss:$16 sps:$4 sm:$0xff]   ;;  %v4267_v21 = vld [vmem:[#allocation12 + $0x304] ss:$16 sps:$4 sm:$0xff]  }
  0xb6   :  { %1862 = vmatpush1.bf16.msra.mxu1 %v4198_v48  ;;  %v4265_v22 = vld [vmem:[#allocation12 + $0x300] ss:$16 sps:$4 sm:$0xff]   ;;  %v4273_v23 = vld [vmem:[#allocation12 + $0x324] ss:$16 sps:$4 sm:$0xff]  }
  0xb7   :  { %1863 = vmatprep.subr.bf16.mxu1 %v4199_v49  ;;  %v4271_v24 = vld [vmem:[#allocation12 + $0x320] ss:$16 sps:$4 sm:$0xff]  }
  0xb8   :  { %v4277_v26 = vld [vmem:[#allocation12 + $0x340] ss:$16 sps:$4 sm:$0xff]  }
  0xba   :  { %1864 = vmatpush1.bf16.msra.mxu1 %v4201_v50 }
  0xbb   :  { %1865 = vmatprep.subr.bf16.mxu1 %v4202_v51 }
  0xbc   :  { %3717 = vmatmul.mubr.msk.bf16.gmra.mrb[12].mxu0 %vm304_vm2, %v4160_v27 }
  0xbd   :  { %435 = vmatprep.mubr.bf16.mxu0 %v4900_v0 }
  0xbe   :  { %1866 = vmatpush1.bf16.msra.mxu1 %v4204_v52 }
  0xbf   :  { %1867 = vmatprep.subr.bf16.mxu1 %v4205_v53 }
  0xc2   :  { %1868 = vmatpush1.bf16.msra.mxu1 %v4207_v54 }
  0xc3   :  { %1869 = vmatprep.subr.bf16.mxu1 %v4208_v55 }
  0xc4   :  { %3719 = vmatmul.mubr.msk.bf16.vlgmr.msra.gmra.mrb[16].mxu0 %vm304_vm2, %v4148_v12  ;;  %v4240_v12 = vld [vmem:[#allocation12 + $0x20c] ss:$16 sps:$4 sm:$0xff]  }
  0xc5   :  { %445 = vmatprep.mubr.bf16.mxu0 %v4900_v0  ;;  %900 = vmatpush1.bf16.msra.mxu0 %v4164_v28  ;;  %v188_v28 = vlaneseq }
  0xc6   :  { %901 = vmatprep.subr.bf16.mxu0 %v4169_v29  ;;  %1870 = vmatpush1.bf16.msra.mxu1 %v4210_v56  ;;  %v4283_v29 = vld [vmem:[#allocation12 + $0x360] ss:$16 sps:$4 sm:$0xff]  }
  0xc7   :  { %1871 = vmatprep.subr.bf16.mxu1 %v4211_v57 }
  0xc9   :  { %902 = vmatpush1.bf16.msra.mxu0 %v4167_v30  ;;  %v4291_v30 = vld [vmem:[#allocation12 + $0xc] ss:$16 sps:$4 sm:$0xff]  }
  0xca   :  { %940 = vmatprep.subr.bf16.mxu0 %v4172_v31  ;;  %1872 = vmatpush1.bf16.msra.mxu1 %v4213_v58  ;;  %v5136_v31 = vshrl.u32 %v188_v28, 7 }
  0xcb   :  { %1873 = vmatprep.subr.bf16.mxu1 %v4214_v59 }
  0xcc   :  { %3720 = vmatmul.mubr.msk.bf16.gmra.mrb[20].mxu0 %vm304_vm2, %v4152_v16  ;;  %v4249_v16 = vld [vmem:[#allocation12 + $0x2a4] ss:$16 sps:$4 sm:$0xff]   ;;  %v5158_v49 = vsub.s32 2, %v5136_v31  ;;  %v5161_v52 = vsub.s32 3, %v5136_v31 }
  0xcd   :  { %455 = vmatprep.mubr.bf16.mxu0 %v4900_v0 }
  0xce   :  { %1874 = vmatpush1.bf16.msra.mxu1 %v4216_v60 }
  0xcf   :  { %1875 = vmatprep.subr.bf16.mxu1 %v4220_v61 }
  0xd2   :  { %1876 = vmatpush1.bf16.msra.mxu1 %v4222_v62 }
  0xd3   :  { %1877 = vmatprep.subr.bf16.mxu1 %v4226_v2 }
  0xd4   :  { %3721 = vmatmul.mubr.msk.bf16.gmra.mrb[24].mxu0 %vm304_vm2, %v4156_v25  ;;  %v4279_v25 = vld [vmem:[#allocation12 + $0x344] ss:$16 sps:$4 sm:$0xff]  }
  0xd5   :  { %465 = vmatprep.mubr.bf16.mxu0 %v4900_v0 }
  0xd6   :  { %1878 = vmatpush1.bf16.msra.mxu1 %v4228_v3 }
  0xd7   :  { %1879 = vmatprep.subr.bf16.mxu1 %v4232_v6 }
  0xda   :  { %1880 = vmatpush1.bf16.msra.mxu1 %v4234_v7 }
  0xdb   :  { %1972 = vmatprep.subr.bf16.mxu1 %v4240_v12 }
  0xdc   :  { %3722 = vmatmul.mubr.msk.bf16.gmra.mrb[28].mxu0 %vm304_vm2, %v4160_v27  ;;  %v4285_v27 = vld [vmem:[#allocation12 + $0x364] ss:$16 sps:$4 sm:$0xff]  }
  0xdd   :  { %931 = vmatprep.mubr.bf16.mxu0 %v4900_v0 }
  0xe4   :  { %3733 = vmatmul.mubr.msk.bf16.vlgmr.msra.gmra.mrb[32].mxu0 %vm895_vm3, %v803_v32 }
  0xe5   :  { %941 = vmatpush1.bf16.msra.mxu0 %v4170_v33  ;;  %972 = vmatprep.mubr.bf16.mxu0 %v4900_v0  ;;  %v186_v33 = vld [vmem:[%s5348_s3] sm:$0xf] }
  0xe6   :  { %942 = vmatprep.subr.bf16.mxu0 %v4175_v34  ;;  %v5145_v34 = vsub.s32 1, %v5136_v31  ;;  %v5165_v62 = vrot.slane %v186_v33, %v5158_v49 }
  0xe9   :  { %943 = vmatpush1.bf16.msra.mxu0 %v4173_v35 }
  0xea   :  { %4102 = vmatprep.subr.bf16.mxu0 %v4901_v1 }
  0xec   :  { %3734 = vmatmul.mubr.msk.bf16.vlgmr.msra.gmra.mrb[36].mxu0 %vm895_vm3, %v803_v32 }
  0xed   :  { %4103 = vmatpush3.bf16.msra.mxu0 %v4176_v36  ;;  %4106 = vmatprep.mubr.msk.bf16.mxu0 %vm4902_vm4, %v4901_v1  ;;  %v5151_v36 = vrot.slane %v186_v33, %v5145_v34 }
  0xee   :  { %4104 = vmatprep.subr.bf16.mxu0 %v4901_v1  ;;  %v4217_v1 = vld [vmem:[#allocation12 + $0x200] ss:$16 sps:$4 sm:$0xff]  }
  0xf1   :  { %4105 = vmatpush3.bf16.msra.mxu0 %v4177_v37 }
  0xf2   :  { %1890 = vmatprep.subr.bf16.mxu0 %v4219_v63 }
  0xf4   :  { %4107 = vmatmul.mubr.msk.bf16.vlgmr.msra.gmra.mrb[40].mxu0 %vm895_vm3, %v803_v32  ;;  %v5139_v32 = vsub.s32 0, %v5136_v31 }
  0xf5   :  { %1891 = vmatpush1.bf16.msra.mxu0 %v4217_v1 }
  0xf6   :  { %1892 = vmatprep.subr.bf16.mxu0 %v4225_v4  ;;  %v5148_v35 = vrot.slane %v186_v33, %v5139_v32  ;;  %v5169_v4 = vrot.slane %v186_v33, %v5161_v52 }
  0xf9   :  { %1893 = vmatpush1.bf16.msra.mxu0 %v4223_v5 }
  0xfa   :  { %1894 = vmatprep.subr.bf16.mxu0 %v4231_v8 }
  0xfd   :  { %1895 = vmatpush1.bf16.msra.mxu0 %v4229_v9 }
  0xfe   :  { %1896 = vmatprep.subr.bf16.mxu0 %v4237_v10 }
 0x101   :  { %1897 = vmatpush1.bf16.msra.mxu0 %v4235_v11 }
 0x102   :  { %1898 = vmatprep.subr.bf16.mxu0 %v4243_v13 }
 0x105   :  { %1899 = vmatpush1.bf16.msra.mxu0 %v4241_v14 }
 0x106   :  { %1900 = vmatprep.subr.bf16.mxu0 %v4249_v16 }
 0x109   :  { %1901 = vmatpush1.bf16.msra.mxu0 %v4247_v15 }
 0x10a   :  { %1902 = vmatprep.subr.bf16.mxu0 %v4255_v17 }
 0x10d   :  { %1903 = vmatpush1.bf16.msra.mxu0 %v4253_v18 }
 0x10e   :  { %1904 = vmatprep.subr.bf16.mxu0 %v4261_v19 }
 0x111   :  { %1905 = vmatpush1.bf16.msra.mxu0 %v4259_v20 }
 0x112   :  { %1906 = vmatprep.subr.bf16.mxu0 %v4267_v21 }
 0x115   :  { %1907 = vmatpush1.bf16.msra.mxu0 %v4265_v22 }
 0x116   :  { %1908 = vmatprep.subr.bf16.mxu0 %v4273_v23 }
 0x119   :  { %1909 = vmatpush1.bf16.msra.mxu0 %v4271_v24 }
 0x11a   :  { %1910 = vmatprep.subr.bf16.mxu0 %v4279_v25 }
 0x11d   :  { %1911 = vmatpush1.bf16.msra.mxu0 %v4277_v26 }
 0x11e   :  { %1912 = vmatprep.subr.bf16.mxu0 %v4285_v27 }
 0x121   :  { %1913 = vmatpush1.bf16.msra.mxu0 %v4283_v29 }
 0x122   :  { %1931 = vmatprep.subr.bf16.mxu0 %v4291_v30 }
 0x177   :  { %v364_v37 = vpop.f32.mrb[0].mxu0 }
 0x178   :  { %v365_v38 = vadd.f32 %v364_v37, %v5148_v35  ;;  %v366_v39 = vpop.f32.mrb[1].mxu0 }
 0x179   :  { %v367_v40 = vadd.f32 %v366_v39, %v5151_v36  ;;  %v368_v41 = vpop.f32.mrb[2].mxu0 }
 0x17a   :  { %v476_v42 = vmax.f32 %v365_v38, 0.0  ;;  %v369_v43 = vadd.f32 %v368_v41, %v5148_v35  ;;  %v370_v44 = vpop.f32.mrb[3].mxu0 }
 0x17b   :  { %v477_v45 = vmax.f32 %v367_v40, 0.0  ;;  %v371_v46 = vadd.f32 %v370_v44, %v5151_v36 }
 0x17c   :  { %v512_v47 = vrot.slane %v476_v42, 4  ;;  %v480_v48 = vmax.f32 %v369_v43, 0.0 }
 0x17d   :  { %v518_v50 = vrot.slane %v477_v45, 4  ;;  %v481_v51 = vmax.f32 %v371_v46, 0.0 }
 0x17e   :  { %v513_v53 = vadd.f32 %v512_v47, %v476_v42  ;;  %v538_v54 = vrot.slane %v480_v48, 4 }
 0x17f   :  { %v519_v55 = vadd.f32 %v518_v50, %v477_v45  ;;  %v544_v56 = vrot.slane %v481_v51, 4  ;;  %v374_v57 = vpop.f32.mrb[4].mxu0 }
 0x180   :  { %v514_v58 = vrot.slane %v513_v53, 2  ;;  %v539_v59 = vadd.f32 %v538_v54, %v480_v48  ;;  %v375_v60 = vadd.f32 %v374_v57, %v5148_v35  ;;  %v376_v61 = vpop.f32.mrb[5].mxu0 }
 0x181   :  { %v520_v63 = vrot.slane %v519_v55, 2  ;;  %v545_v1 = vadd.f32 %v544_v56, %v481_v51  ;;  %v377_v2 = vadd.f32 %v376_v61, %v5151_v36  ;;  %v378_v3 = vpop.f32.mrb[6].mxu0 }
 0x182   :  { %v515_v5 = vadd.f32 %v514_v58, %v513_v53  ;;  %v540_v6 = vrot.slane %v539_v59, 2  ;;  %v484_v7 = vmax.f32 %v375_v60, 0.0  ;;  %v379_v8 = vadd.f32 %v378_v3, %v5148_v35  ;;  %v380_v9 = vpop.f32.mrb[7].mxu0 }
 0x183   :  { %v521_v10 = vadd.f32 %v520_v63, %v519_v55  ;;  %v546_v11 = vrot.slane %v545_v1, 2  ;;  %v485_v12 = vmax.f32 %v377_v2, 0.0  ;;  %v381_v13 = vadd.f32 %v380_v9, %v5151_v36 }
 0x184   :  { %v516_v14 = vrot.slane %v515_v5, 1  ;;  %v541_v15 = vadd.f32 %v540_v6, %v539_v59  ;;  %v563_v16 = vrot.slane %v484_v7, 4  ;;  %v488_v17 = vmax.f32 %v379_v8, 0.0 }
 0x185   :  { %v522_v18 = vrot.slane %v521_v10, 1  ;;  %v547_v19 = vadd.f32 %v546_v11, %v545_v1  ;;  %v569_v20 = vrot.slane %v485_v12, 4  ;;  %v489_v21 = vmax.f32 %v381_v13, 0.0 }
 0x186   :  { %v517_v22 = vadd.f32 %v516_v14, %v515_v5  ;;  %v542_v23 = vrot.slane %v541_v15, 1  ;;  %v564_v24 = vadd.f32 %v563_v16, %v484_v7  ;;  %v588_v25 = vrot.slane %v488_v17, 4 }
 0x187   :  { %v523_v26 = vadd.f32 %v522_v18, %v521_v10  ;;  %v548_v27 = vrot.slane %v547_v19, 1  ;;  %v570_v28 = vadd.f32 %v569_v20, %v485_v12  ;;  %v594_v29 = vrot.slane %v489_v21, 4  ;;  %v384_v30 = vpop.f32.mrb[8].mxu0 }
 0x188   :  { %v543_v33 = vadd.f32 %v542_v23, %v541_v15  ;;  %v565_v37 = vrot.slane %v564_v24, 2  ;;  %v589_v38 = vadd.f32 %v588_v25, %v488_v17  ;;  %v385_v39 = vadd.f32 %v384_v30, %v5148_v35  ;;  %v386_v40 = vpop.f32.mrb[9].mxu0 }
 0x189   :  { %v549_v41 = vadd.f32 %v548_v27, %v547_v19  ;;  %v571_v42 = vrot.slane %v570_v28, 2  ;;  %v595_v43 = vadd.f32 %v594_v29, %v489_v21  ;;  %v387_v44 = vadd.f32 %v386_v40, %v5151_v36  ;;  %v388_v45 = vpop.f32.mrb[10].mxu0 }
 0x18a   :  { %v746_v46 = vsel %vm745_vm5, %v543_v33, %v517_v22  ;;  %v566_v47 = vadd.f32 %v565_v37, %v564_v24  ;;  %v590_v48 = vrot.slane %v589_v38, 2  ;;  %v492_v50 = vmax.f32 %v385_v39, 0.0  ;;  %v390_v51 = vpop.f32.mrb[11].mxu0 }
 0x18b   :  { %v759_v53 = vsel %vm745_vm5, %v549_v41, %v523_v26  ;;  %v572_v54 = vadd.f32 %v571_v42, %v570_v28  ;;  %v596_v55 = vrot.slane %v595_v43, 2  ;;  %v493_v56 = vmax.f32 %v387_v44, 0.0 }
 0x18c   :  { %v567_v57 = vrot.slane %v566_v47, 1  ;;  %v591_v58 = vadd.f32 %v590_v48, %v589_v38  ;;  %v613_v59 = vrot.slane %v492_v50, 4  ;;  %v389_v60 = vadd.f32 %v388_v45, %v5148_v35 }
 0x18d   :  { %v573_v61 = vrot.slane %v572_v54, 1  ;;  %v597_v63 = vadd.f32 %v596_v55, %v595_v43  ;;  %v619_v1 = vrot.slane %v493_v56, 4  ;;  %v391_v2 = vadd.f32 %v390_v51, %v5151_v36 }
 0x18e   :  { %v568_v3 = vadd.f32 %v567_v57, %v566_v47  ;;  %v592_v5 = vrot.slane %v591_v58, 1  ;;  %v614_v6 = vadd.f32 %v613_v59, %v492_v50  ;;  %v496_v7 = vmax.f32 %v389_v60, 0.0 }
 0x18f   :  { %v574_v8 = vadd.f32 %v573_v61, %v572_v54  ;;  %v598_v9 = vrot.slane %v597_v63, 1  ;;  %v620_v10 = vadd.f32 %v619_v1, %v493_v56  ;;  %v497_v11 = vmax.f32 %v391_v2, 0.0  ;;  %v394_v12 = vpop.f32.mrb[12].mxu0 }
 0x190   :  { %v748_v13 = vsel %vm747_vm6, %v568_v3, %v746_v46  ;;  %v593_v14 = vadd.f32 %v592_v5, %v591_v58  ;;  %v615_v15 = vrot.slane %v614_v6, 2  ;;  %v638_v16 = vrot.slane %v496_v7, 4  ;;  %v396_v17 = vpop.f32.mrb[13].mxu0 }
 0x191   :  { %v760_v18 = vsel %vm747_vm6, %v574_v8, %v759_v53  ;;  %v599_v19 = vadd.f32 %v598_v9, %v597_v63  ;;  %v621_v20 = vrot.slane %v620_v10, 2  ;;  %v644_v21 = vrot.slane %v497_v11, 4  ;;  %v398_v22 = vpop.f32.mrb[14].mxu0 }
 0x192   :  { %v750_v23 = vsel %vm749_vm7, %v593_v14, %v748_v13  ;;  %v616_v24 = vadd.f32 %v615_v15, %v614_v6  ;;  %v639_v25 = vadd.f32 %v638_v16, %v496_v7  ;;  %v395_v26 = vadd.f32 %v394_v12, %v5148_v35  ;;  %v400_v27 = vpop.f32.mrb[15].mxu0 }
 0x193   :  { %v761_v28 = vsel %vm749_vm7, %v599_v19, %v760_v18  ;;  %v622_v29 = vadd.f32 %v621_v20, %v620_v10  ;;  %v645_v30 = vadd.f32 %v644_v21, %v497_v11  ;;  %v397_v33 = vadd.f32 %v396_v17, %v5151_v36 }
 0x194   :  { %v617_v37 = vrot.slane %v616_v24, 1  ;;  %v640_v38 = vrot.slane %v639_v25, 2  ;;  %v500_v39 = vmax.f32 %v395_v26, 0.0  ;;  %v399_v40 = vadd.f32 %v398_v22, %v5148_v35 }
 0x195   :  { %v623_v41 = vrot.slane %v622_v29, 1  ;;  %v646_v42 = vrot.slane %v645_v30, 2  ;;  %v501_v43 = vmax.f32 %v397_v33, 0.0  ;;  %v401_v44 = vadd.f32 %v400_v27, %v5151_v36 }
 0x196   :  { %v618_v45 = vadd.f32 %v617_v37, %v616_v24  ;;  %v641_v46 = vadd.f32 %v640_v38, %v639_v25  ;;  %v663_v47 = vrot.slane %v500_v39, 4  ;;  %v504_v48 = vmax.f32 %v399_v40, 0.0 }
 0x197   :  { %v624_v50 = vadd.f32 %v623_v41, %v622_v29  ;;  %v647_v51 = vadd.f32 %v646_v42, %v645_v30  ;;  %v669_v53 = vrot.slane %v501_v43, 4  ;;  %v505_v54 = vmax.f32 %v401_v44, 0.0  ;;  %v437_v55 = vpop.f32.mrb[16].mxu0 }
 0x198   :  { %v752_v56 = vsel %vm751_vm8, %v618_v45, %v750_v23  ;;  %v642_v57 = vrot.slane %v641_v46, 1  ;;  %v664_v58 = vadd.f32 %v663_v47, %v500_v39  ;;  %v688_v35 = vrot.slane %v504_v48, 4  ;;  %v439_v59 = vpop.f32.mrb[17].mxu0 }
 0x199   :  { %v762_v60 = vsel %vm751_vm8, %v624_v50, %v761_v28  ;;  %v648_v61 = vrot.slane %v647_v51, 1  ;;  %v670_v36 = vadd.f32 %v669_v53, %v501_v43  ;;  %v694_v63 = vrot.slane %v505_v54, 4  ;;  %v441_v1 = vpop.f32.mrb[18].mxu0 }
 0x19a   :  { %v643_v2 = vadd.f32 %v642_v57, %v641_v46  ;;  %v665_v3 = vrot.slane %v664_v58, 2  ;;  %v689_v5 = vadd.f32 %v688_v35, %v504_v48  ;;  %v438_v6 = vadd.f32 %v437_v55, %v5165_v62  ;;  %v443_v7 = vpop.f32.mrb[19].mxu0 }
 0x19b   :  { %v649_v8 = vadd.f32 %v648_v61, %v647_v51  ;;  %v671_v9 = vrot.slane %v670_v36, 2  ;;  %v695_v10 = vadd.f32 %v694_v63, %v505_v54  ;;  %v440_v11 = vadd.f32 %v439_v59, %v5169_v4 }
 0x19c   :  { %v754_v12 = vsel %vm753_vm9, %v643_v2, %v752_v56  ;;  %v666_v13 = vadd.f32 %v665_v3, %v664_v58  ;;  %v690_v14 = vrot.slane %v689_v5, 2  ;;  %v478_v15 = vmax.f32 %v438_v6, 0.0 }
 0x19d   :  { %v763_v16 = vsel %vm753_vm9, %v649_v8, %v762_v60  ;;  %v672_v17 = vadd.f32 %v671_v9, %v670_v36  ;;  %v696_v18 = vrot.slane %v695_v10, 2  ;;  %v479_v19 = vmax.f32 %v440_v11, 0.0 }
 0x19e   :  { %v667_v20 = vrot.slane %v666_v13, 1  ;;  %v691_v21 = vadd.f32 %v690_v14, %v689_v5  ;;  %v524_v22 = vrot.slane %v478_v15, 4  ;;  %v442_v23 = vadd.f32 %v441_v1, %v5165_v62 }
 0x19f   :  { %v673_v24 = vrot.slane %v672_v17, 1  ;;  %v697_v25 = vadd.f32 %v696_v18, %v695_v10  ;;  %v531_v26 = vsel %vm160_vm0, %v479_v19, 0.0  ;;  %v444_v27 = vadd.f32 %v443_v7, %v5169_v4  ;;  %v447_v28 = vpop.f32.mrb[20].mxu0 }
 0x1a0   :  { %v668_v29 = vadd.f32 %v667_v20, %v666_v13  ;;  %v692_v30 = vrot.slane %v691_v21, 1  ;;  %v525_v33 = vadd.f32 %v524_v22, %v478_v15  ;;  %v532_v37 = vrot.slane %v531_v26, 4  ;;  %v449_v38 = vpop.f32.mrb[21].mxu0 }
 0x1a1   :  { %v674_v39 = vadd.f32 %v673_v24, %v672_v17  ;;  %v698_v40 = vrot.slane %v697_v25, 1  ;;  %v482_v41 = vmax.f32 %v442_v23, 0.0  ;;  %v483_v42 = vmax.f32 %v444_v27, 0.0  ;;  %v451_v43 = vpop.f32.mrb[22].mxu0 }
 0x1a2   :  { %v756_v44 = vsel %vm755_vm10, %v668_v29, %v754_v12  ;;  %v693_v45 = vadd.f32 %v692_v30, %v691_v21  ;;  %v526_v46 = vrot.slane %v525_v33, 2  ;;  %v533_v47 = vadd.f32 %v532_v37, %v531_v26  ;;  %v453_v48 = vpop.f32.mrb[23].mxu0 }
 0x1a3   :  { %v764_v50 = vsel %vm755_vm10, %v674_v39, %v763_v16  ;;  %v699_v51 = vadd.f32 %v698_v40, %v697_v25  ;;  %v550_v53 = vrot.slane %v482_v41, 4  ;;  %v556_v54 = vsel %vm160_vm0, %v483_v42, 0.0 }
 0x1a4   :  { %v5200_v55 = vsel %vm757_vm11, %v693_v45, %v756_v44  ;;  %v527_v56 = vadd.f32 %v526_v46, %v525_v33  ;;  %v534_v57 = vrot.slane %v533_v47, 2  ;;  %v557_v58 = vrot.slane %v556_v54, 4 }
 0x1a5   :  { %v5203_v35 = vsel %vm757_vm11, %v699_v51, %v764_v50  ;;  %v551_v59 = vadd.f32 %v550_v53, %v482_v41  ;;  %v448_v60 = vadd.f32 %v447_v28, %v5165_v62  ;;  %v450_v3 = vadd.f32 %v449_v38, %v5169_v4 }
 0x1a6   :  { %v528_v61 = vrot.slane %v527_v56, 1  ;;  %v535_v36 = vadd.f32 %v534_v57, %v533_v47  ;;  %v558_v63 = vadd.f32 %v557_v58, %v556_v54  ;;  %v452_v5 = vadd.f32 %v451_v43, %v5165_v62 }
 0x1a7   :  { %v552_v1 = vrot.slane %v551_v59, 2  ;;  %v486_v2 = vmax.f32 %v448_v60, 0.0  ;;  %v457_v6 = vpop.f32.mrb[24].mxu0  ;;  %v454_v10 = vadd.f32 %v453_v48, %v5169_v4  ;;  %v487_v14 = vmax.f32 %v450_v3, 0.0 }
 0x1a8   :  { %v529_v7 = vadd.f32 %v528_v61, %v527_v56  ;;  %v536_v8 = vrot.slane %v535_v36, 1  ;;  %v559_v9 = vrot.slane %v558_v63, 2  ;;  %v459_v11 = vpop.f32.mrb[25].mxu0  ;;  %v490_v15 = vmax.f32 %v452_v5, 0.0 }
 0x1a9   :  { %v553_v12 = vadd.f32 %v552_v1, %v551_v59  ;;  %v575_v13 = vrot.slane %v486_v2, 4  ;;  %v461_v16 = vpop.f32.mrb[26].mxu0  ;;  %v491_v19 = vmax.f32 %v454_v10, 0.0  ;;  %v458_v20 = vadd.f32 %v457_v6, %v5165_v62 }
 0x1aa   :  { %v537_v17 = vadd.f32 %v536_v8, %v535_v36  ;;  %v560_v18 = vadd.f32 %v559_v9, %v558_v63  ;;  %v463_v21 = vpop.f32.mrb[27].mxu0  ;;  %v581_v24 = vsel %vm160_vm0, %v487_v14, 0.0  ;;  %v600_v25 = vrot.slane %v490_v15, 4 }
 0x1ab   :  { %v554_v22 = vrot.slane %v553_v12, 1  ;;  %v576_v23 = vadd.f32 %v575_v13, %v486_v2  ;;  %v582_v27 = vrot.slane %v581_v24, 4  ;;  %v606_v28 = vsel %vm160_vm0, %v491_v19, 0.0 }
 0x1ac   :  { %v561_v26 = vrot.slane %v560_v18, 1  ;;  %v494_v29 = vmax.f32 %v458_v20, 0.0  ;;  %v601_v37 = vadd.f32 %v600_v25, %v490_v15  ;;  %v607_v38 = vrot.slane %v606_v28, 4 }
 0x1ad   :  { %v555_v30 = vadd.f32 %v554_v22, %v553_v12  ;;  %v577_v33 = vrot.slane %v576_v23, 2  ;;  %v583_v40 = vadd.f32 %v582_v27, %v581_v24  ;;  %v460_v42 = vadd.f32 %v459_v11, %v5169_v4 }
 0x1ae   :  { %v562_v39 = vadd.f32 %v561_v26, %v560_v18  ;;  %v625_v41 = vrot.slane %v494_v29, 4  ;;  %v602_v45 = vrot.slane %v601_v37, 2  ;;  %v608_v46 = vadd.f32 %v607_v38, %v606_v28 }
 0x1af   :  { %v766_v43 = vsel %vm745_vm5, %v555_v30, %v529_v7  ;;  %v578_v44 = vadd.f32 %v577_v33, %v576_v23  ;;  %v467_v47 = vpop.f32.mrb[28].mxu0  ;;  %v584_v50 = vrot.slane %v583_v40, 2  ;;  %v495_v53 = vmax.f32 %v460_v42, 0.0 }
 0x1b0   :  { %v773_v48 = vsel %vm745_vm5, %v562_v39, %v537_v17  ;;  %v626_v51 = vadd.f32 %v625_v41, %v494_v29  ;;  %v469_v54 = vpop.f32.mrb[29].mxu0  ;;  %v603_v57 = vadd.f32 %v602_v45, %v601_v37  ;;  %v609_v58 = vrot.slane %v608_v46, 2 }
 0x1b1   :  { %v579_v56 = vrot.slane %v578_v44, 1  ;;  %v462_v59 = vadd.f32 %v461_v16, %v5165_v62  ;;  %v471_v60 = vpop.f32.mrb[30].mxu0  ;;  %v585_v61 = vadd.f32 %v584_v50, %v583_v40  ;;  %v631_v63 = vsel %vm160_vm0, %v495_v53, 0.0 }
 0x1b2   :  { %v627_v36 = vrot.slane %v626_v51, 2  ;;  %v464_v1 = vadd.f32 %v463_v21, %v5169_v4  ;;  %v473_v2 = vpop.f32.mrb[31].mxu0  ;;  %v604_v5 = vrot.slane %v603_v57, 1  ;;  %v610_v6 = vadd.f32 %v609_v58, %v608_v46 }
 0x1b3   :  { %v580_v3 = vadd.f32 %v579_v56, %v578_v44  ;;  %v632_v7 = vrot.slane %v631_v63, 4  ;;  %v586_v8 = vrot.slane %v585_v61, 1  ;;  %v498_v10 = vmax.f32 %v462_v59, 0.0 }
 0x1b4   :  { %v628_v9 = vadd.f32 %v627_v36, %v626_v51  ;;  %v499_v11 = vmax.f32 %v464_v1, 0.0  ;;  %v605_v13 = vadd.f32 %v604_v5, %v603_v57  ;;  %v611_v14 = vrot.slane %v610_v6, 1 }
 0x1b5   :  { %v767_v12 = vsel %vm747_vm6, %v580_v3, %v766_v43  ;;  %v633_v15 = vadd.f32 %v632_v7, %v631_v63  ;;  %v587_v16 = vadd.f32 %v586_v8, %v585_v61  ;;  %v650_v18 = vrot.slane %v498_v10, 4 }
 0x1b6   :  { %v629_v17 = vrot.slane %v628_v9, 1  ;;  %v656_v19 = vsel %vm160_vm0, %v499_v11, 0.0  ;;  %v768_v20 = vsel %vm749_vm7, %v605_v13, %v767_v12  ;;  %v612_v21 = vadd.f32 %v611_v14, %v610_v6 }
 0x1b7   :  { %v634_v22 = vrot.slane %v633_v15, 2  ;;  %v657_v23 = vrot.slane %v656_v19, 4  ;;  %v5221_v24 = vpop.f32.mrb[32].mxu0  ;;  %v774_v25 = vsel %vm747_vm6, %v587_v16, %v773_v48  ;;  %v651_v27 = vadd.f32 %v650_v18, %v498_v10 }
 0x1b8   :  { %v630_v26 = vadd.f32 %v629_v17, %v628_v9  ;;  %v468_v28 = vadd.f32 %v467_v47, %v5165_v62  ;;  %v5225_v29 = vpop.f32.mrb[33].mxu0  ;;  %v775_v30 = vsel %vm749_vm7, %v612_v21, %v774_v25  ;;  %v470_v38 = vadd.f32 %v469_v54, %v5169_v4  ;;  %v4238_v17 = vld [vmem:[#allocation12 + $0x208] ss:$16 sps:$4 sm:$0xff]  }
 0x1b9   :  { %v635_v33 = vadd.f32 %v634_v22, %v633_v15  ;;  %v658_v37 = vadd.f32 %v657_v23, %v656_v19  ;;  %v937_v39 = vpop.f32.mrb[34].mxu0  ;;  %v652_v41 = vrot.slane %v651_v27, 2  ;;  %v472_v43 = vadd.f32 %v471_v60, %v5165_v62  ;;  %v4246_v22 = vld [vmem:[#allocation12 + $0x22c] ss:$16 sps:$4 sm:$0xff]  }
 0x1ba   :  { %v769_v40 = vsel %vm751_vm8, %v630_v26, %v768_v20  ;;  %v502_v42 = vmax.f32 %v468_v28, 0.0  ;;  %v938_v44 = vpop.f32.mrb[35].mxu0  ;;  %v503_v48 = vmax.f32 %v470_v38, 0.0  ;;  %v474_v47 = vadd.f32 %v473_v2, %v5169_v4  ;;  %v4244_v38 = vld [vmem:[#allocation12 + $0x228] ss:$16 sps:$4 sm:$0xff]  }
 0x1bb   :  { %v636_v45 = vrot.slane %v635_v33, 1  ;;  %v659_v46 = vrot.slane %v658_v37, 2  ;;  %v653_v50 = vadd.f32 %v652_v41, %v651_v27  ;;  %v506_v53 = vmax.f32 %v472_v43, 0.0 }
 0x1bc   :  { %v675_v51 = vrot.slane %v502_v42, 4  ;;  %v800_v56 = vmul.f32 0.125, %v5203_v35  ;;  %v681_v58 = vsel %vm160_vm0, %v503_v48, 0.0  ;;  %v507_v59 = vmax.f32 %v474_v47, 0.0 }
 0x1bd   :  { %v637_v57 = vadd.f32 %v636_v45, %v635_v33  ;;  %v660_v54 = vadd.f32 %v659_v46, %v658_v37  ;;  %v654_v61 = vrot.slane %v653_v50, 1  ;;  %v682_v63 = vrot.slane %v681_v58, 4 }
 0x1be   :  { %v676_v36 = vadd.f32 %v675_v51, %v502_v42  ;;  %v700_v62 = vrot.slane %v506_v53, 4  ;;  %v706_v3 = vsel %vm160_vm0, %v507_v59, 0.0  ;;  %v5236_v4 = vpack.c.bf16 %v800_v56, %v800_v56 }
 0x1bf   :  { %v776_v60 = vsel %vm751_vm8, %v637_v57, %v775_v30  ;;  %v661_v1 = vrot.slane %v660_v54, 1  ;;  %v974_v2 = vpop.f32.mrb[36].mxu0  ;;  %v655_v5 = vadd.f32 %v654_v61, %v653_v50  ;;  %v683_v35 = vadd.f32 %v682_v63, %v681_v58  ;;  %v4250_v57 = vld [vmem:[#allocation12 + $0x248] ss:$16 sps:$4 sm:$0xff]  }
 0x1c0   :  { %v677_v6 = vrot.slane %v676_v36, 2  ;;  %v701_v7 = vadd.f32 %v700_v62, %v506_v53  ;;  %v5238_v8 = vpop.f32.mrb[37].mxu0  ;;  %v707_v10 = vrot.slane %v706_v3, 4  ;;  %1881 = vmatprep.mubr.bf16.mxu1 %v5236_v4  ;;  %v799_v11 = vmul.f32 0.125, %v5200_v55  ;;  %v5249_v55 = vld [vmem:[%s5350_s5] sm:$0x1f] }
 0x1c1   :  { %v662_v9 = vadd.f32 %v661_v1, %v660_v54  ;;  %v978_v12 = vpop.f32.mrb[38].mxu0  ;;  %v770_v13 = vsel %vm753_vm9, %v655_v5, %v769_v40  ;;  %v684_v15 = vrot.slane %v683_v35, 2  ;;  %v829_v28 = vrot.slane %v5249_v55, %v5158_v49  ;;  %v4252_v40 = vld [vmem:[#allocation12 + $0x24c] ss:$16 sps:$4 sm:$0xff]   ;;  %v511_v58 = vld [vmem:[#allocation2 + $0x18] sm:$0xff] }
 0x1c2   :  { %v678_v14 = vadd.f32 %v677_v6, %v676_v36  ;;  %v702_v16 = vrot.slane %v701_v7, 2  ;;  %v979_v18 = vpop.f32.mrb[39].mxu0  ;;  %v708_v20 = vadd.f32 %v707_v10, %v706_v3  ;;  %v5244_v21 = vpack.c.bf16 %v799_v11, %v799_v11  ;;  %v4256_v62 = vld [vmem:[#allocation12 + $0x268] ss:$16 sps:$4 sm:$0xff]   ;;  %v4270_v3 = vld [vmem:[#allocation12 + $0x2ac] ss:$16 sps:$4 sm:$0xff]  }
 0x1c3   :  { %v777_v19 = vsel %vm753_vm9, %v662_v9, %v776_v60  ;;  %v685_v25 = vadd.f32 %v684_v15, %v683_v35  ;;  %v5254_v41 = vadd.f32 %v974_v2, %v829_v28  ;;  %v836_v42 = vsub.s32 4, %v5136_v31  ;;  %v4258_v31 = vld [vmem:[#allocation12 + $0x26c] ss:$16 sps:$4 sm:$0xff]   ;;  %v4262_v1 = vld [vmem:[#allocation12 + $0x288] ss:$16 sps:$4 sm:$0xff]  }
 0x1c4   :  { %v679_v23 = vrot.slane %v678_v14, 1  ;;  %v703_v26 = vadd.f32 %v702_v16, %v701_v7  ;;  %v709_v27 = vrot.slane %v708_v20, 2  ;;  %1882 = vmatmul.mubr.bf16.vlgmr.msra.gmra.mrb[0].mxu1 %v5244_v21  ;;  %v4264_v60 = vld [vmem:[#allocation12 + $0x28c] ss:$16 sps:$4 sm:$0xff]   ;;  %v4268_v2 = vld [vmem:[#allocation12 + $0x2a8] ss:$16 sps:$4 sm:$0xff]  }
 0x1c5   :  { %v686_v33 = vrot.slane %v685_v25, 1  ;;  %1973 = vmatpush1.bf16.msra.mxu1 %v4238_v17  ;;  %v837_v50 = vrot.slane %v5249_v55, %v836_v42  ;;  %v4276_v5 = vld [vmem:[#allocation12 + $0x2cc] ss:$16 sps:$4 sm:$0xff]   ;;  %v4274_v9 = vld [vmem:[#allocation12 + $0x2c8] ss:$16 sps:$4 sm:$0xff]  }
 0x1c6   :  { %v680_v30 = vadd.f32 %v679_v23, %v678_v14  ;;  %v704_v37 = vrot.slane %v703_v26, 1  ;;  %v710_v39 = vadd.f32 %v709_v27, %v708_v20  ;;  %1974 = vmatprep.subr.bf16.mxu1 %v4246_v22  ;;  %v4289_v11 = vld [vmem:[#allocation12 + $0x8] ss:$16 sps:$4 sm:$0xff]   ;;  %v4282_v12 = vld [vmem:[#allocation12 + $0x2ec] ss:$16 sps:$4 sm:$0xff]  }
 0x1c7   :  { %v1015_v43 = vpop.f32.mrb[40].mxu0  ;;  %v687_v45 = vadd.f32 %v686_v33, %v685_v25  ;;  %v4297_v14 = vld [vmem:[#allocation12 + $0x2c] ss:$16 sps:$4 sm:$0xff]   ;;  %v4280_v15 = vld [vmem:[#allocation12 + $0x2e8] ss:$16 sps:$4 sm:$0xff]  }
 0x1c8   :  { %v771_v44 = vsel %vm755_vm10, %v680_v30, %v770_v13  ;;  %v705_v46 = vadd.f32 %v704_v37, %v703_v26  ;;  %v4108_v48 = vpop.f32.mrb[41].mxu0  ;;  %v711_v47 = vrot.slane %v710_v39, 1  ;;  %v5261_v61 = vadd.f32 %v1015_v43, %v837_v50  ;;  %v4295_v16 = vld [vmem:[#allocation12 + $0x28] ss:$16 sps:$4 sm:$0xff]   ;;  %v4288_v17 = vld [vmem:[#allocation12 + $0x30c] ss:$16 sps:$4 sm:$0xff]  }
 0x1c9   :  { %v1018_v51 = vpop.f32.mrb[42].mxu0  ;;  %v778_v53 = vsel %vm755_vm10, %v687_v45, %v777_v19  ;;  %1975 = vmatpush1.bf16.msra.mxu1 %v4244_v38  ;;  %v4303_v18 = vld [vmem:[#allocation12 + $0x4c] ss:$16 sps:$4 sm:$0xff]   ;;  %v4286_v19 = vld [vmem:[#allocation12 + $0x308] ss:$16 sps:$4 sm:$0xff]   ;;  %v825_v38 = vrot.slane %v5249_v55, %v5145_v34 }
 0x1ca   :  { %v772_v56 = vsel %vm757_vm11, %v705_v46, %v771_v44  ;;  %v4109_v54 = vpop.f32.mrb[43].mxu0  ;;  %v712_v59 = vadd.f32 %v711_v47, %v710_v39  ;;  %1976 = vmatprep.subr.bf16.mxu1 %v4252_v40  ;;  %v4301_v20 = vld [vmem:[#allocation12 + $0x48] ss:$16 sps:$4 sm:$0xff]   ;;  %v4294_v22 = vld [vmem:[#allocation12 + $0x32c] ss:$16 sps:$4 sm:$0xff]  }
 0x1cb   :  { %v801_v35 = vmul.f32 0.125, %v772_v56  ;;  %v4309_v23 = vld [vmem:[#allocation12 + $0x6c] ss:$16 sps:$4 sm:$0xff]   ;;  %v4292_v25 = vld [vmem:[#allocation12 + $0x328] ss:$16 sps:$4 sm:$0xff]   ;;  %v936_v44 = vadd.f32 %v5225_v29, %v825_v38 }
 0x1cc   :  { %v779_v36 = vsel %vm757_vm11, %v712_v59, %v778_v53  ;;  %v4307_v26 = vld [vmem:[#allocation12 + $0x68] ss:$16 sps:$4 sm:$0xff]   ;;  %v4300_v27 = vld [vmem:[#allocation12 + $0x34c] ss:$16 sps:$4 sm:$0xff]   ;;  %v4312_v42 = vld [vmem:[#allocation11 + $0x4] ss:$16 sps:$4 sm:$0xff]  }
 0x1cd   :  { %v787_v63 = vadd.f32 %v779_v36, %v511_v58  ;;  %1977 = vmatpush1.bf16.msra.mxu1 %v4250_v57  ;;  %v1172_v13 = vpack.c.bf16 %v801_v35, %v801_v35  ;;  %v4315_v28 = vld [vmem:[#allocation12 + $0x8c] ss:$16 sps:$4 sm:$0xff]   ;;  %v4313_v30 = vld [vmem:[#allocation12 + $0x88] ss:$16 sps:$4 sm:$0xff]   ;;  %v4310_v45 = vld [vmem:[#allocation11] ss:$16 sps:$4 sm:$0xff]   ;;  %v5271_v50 = vpack.c.bf16 %v936_v44, %v936_v44 }
 0x1ce   :  { %1978 = vmatprep.subr.bf16.mxu1 %v4258_v31  ;;  %v4306_v33 = vld [vmem:[#allocation12 + $0x36c] ss:$16 sps:$4 sm:$0xff]   ;;  %v4304_v39 = vld [vmem:[#allocation12 + $0x368] ss:$16 sps:$4 sm:$0xff]   ;;  %v4318_v48 = vld [vmem:[#allocation11 + $0x24] ss:$16 sps:$4 sm:$0xff]  }
 0x1cf   :  { %791 = vst.msk [vmem:[#allocation2 + $0x18] sm:$0xff] %vm160_vm0, %v787_v63  ;;  %v4321_v37 = vld [vmem:[#allocation12 + $0xac] ss:$16 sps:$4 sm:$0xff]   ;;  %v4319_v40 = vld [vmem:[#allocation12 + $0xa8] ss:$16 sps:$4 sm:$0xff]  }
 0x1d0   :  { %v4327_v43 = vld [vmem:[#allocation12 + $0xcc] ss:$16 sps:$4 sm:$0xff]   ;;  %v4325_v46 = vld [vmem:[#allocation12 + $0xc8] ss:$16 sps:$4 sm:$0xff]   ;;  %v4316_v51 = vld [vmem:[#allocation11 + $0x20] ss:$16 sps:$4 sm:$0xff]  }
 0x1d1   :  { %1979 = vmatpush1.bf16.msra.mxu1 %v4256_v62  ;;  %v4333_v47 = vld [vmem:[#allocation12 + $0xec] ss:$16 sps:$4 sm:$0xff]   ;;  %v4331_v53 = vld [vmem:[#allocation12 + $0xe8] ss:$16 sps:$4 sm:$0xff]   ;;  %v4324_v56 = vld [vmem:[#allocation11 + $0x44] ss:$16 sps:$4 sm:$0xff]  }
 0x1d2   :  { %1980 = vmatprep.subr.bf16.mxu1 %v4264_v60  ;;  %v4339_v57 = vld [vmem:[#allocation12 + $0x10c] ss:$16 sps:$4 sm:$0xff]   ;;  %v4322_v29 = vld [vmem:[#allocation11 + $0x40] ss:$16 sps:$4 sm:$0xff]   ;;  %v4337_v54 = vld [vmem:[#allocation12 + $0x108] ss:$16 sps:$4 sm:$0xff]  }
 0x1d3   :  { %v4330_v58 = vld [vmem:[#allocation11 + $0x64] ss:$16 sps:$4 sm:$0xff]   ;;  %v4345_v59 = vld [vmem:[#allocation12 + $0x12c] ss:$16 sps:$4 sm:$0xff]   ;;  %v4328_v31 = vld [vmem:[#allocation11 + $0x60] ss:$16 sps:$4 sm:$0xff]  }
 0x1d4   :  { %v4343_v36 = vld [vmem:[#allocation12 + $0x128] ss:$16 sps:$4 sm:$0xff]   ;;  %v4336_v63 = vld [vmem:[#allocation11 + $0x84] ss:$16 sps:$4 sm:$0xff]   ;;  %v4351_v62 = vld [vmem:[#allocation12 + $0x14c] ss:$16 sps:$4 sm:$0xff]  }
 0x1d5   :  { %1981 = vmatpush1.bf16.msra.mxu1 %v4262_v1  ;;  %v4334_v60 = vld [vmem:[#allocation11 + $0x80] ss:$16 sps:$4 sm:$0xff]   ;;  %v4349_v1 = vld [vmem:[#allocation12 + $0x148] ss:$16 sps:$4 sm:$0xff]   ;;  %v4348_v35 = vld [vmem:[#allocation11 + $0xc4] ss:$16 sps:$4 sm:$0xff]  }
 0x1d6   :  { %1982 = vmatprep.subr.bf16.mxu1 %v4270_v3  ;;  %v798_v6 = vld [vmem:[#allocation2 + $0x18] sm:$0xff]  ;;  %v4397_v44 = vld [vmem:[#allocation11 + $0x240] ss:$16 sps:$4 sm:$0xff]  }
 0x1d7   :  { %v802_v7 = vmul.f32 0.125, %v798_v6  ;;  %v4342_v3 = vld [vmem:[#allocation11 + $0xa4] ss:$16 sps:$4 sm:$0xff]   ;;  %v4355_v6 = vld [vmem:[#allocation12 + $0x168] ss:$16 sps:$4 sm:$0xff]  }
 0x1d9   :  { %1983 = vmatpush1.bf16.msra.mxu1 %v4268_v2  ;;  %v1173_v10 = vpack.c.bf16 %v802_v7, %v802_v7  ;;  %v4357_v2 = vld [vmem:[#allocation12 + $0x16c] ss:$16 sps:$4 sm:$0xff]  }
 0x1da   :  { %1984 = vmatprep.subr.bf16.mxu1 %v4276_v5  ;;  %v4340_v5 = vld [vmem:[#allocation11 + $0xa0] ss:$16 sps:$4 sm:$0xff]   ;;  %v4363_v7 = vld [vmem:[#allocation12 + $0x18c] ss:$16 sps:$4 sm:$0xff]  }
 0x1db   :  { %3848 = vmatprep.mubr.msk.bf16.mxu0 %vm160_vm0, %v1173_v10  ;;  %3849 = vmatprep.mubr.msk.bf16.mxu1 %vm160_vm0, %v1173_v10  ;;  %v4361_v10 = vld [vmem:[#allocation12 + $0x188] ss:$16 sps:$4 sm:$0xff]  }
 0x1dc   :  { %1923 = vmatmul.mubr.bf16.vlgmr.msra.gmra.mrb[44].mxu0 %v1172_v13 }
 0x1dd   :  { %1985 = vmatpush1.bf16.msra.mxu1 %v4274_v9  ;;  %1932 = vmatpush1.bf16.msra.mxu0 %v4289_v11  ;;  %v4346_v9 = vld [vmem:[#allocation11 + $0xc0] ss:$16 sps:$4 sm:$0xff]   ;;  %v4354_v11 = vld [vmem:[#allocation11 + $0xe4] ss:$16 sps:$4 sm:$0xff]  }
 0x1de   :  { %1986 = vmatprep.subr.bf16.mxu1 %v4282_v12  ;;  %1963 = vmatprep.mubr.bf16.mxu0 %v5236_v4  ;;  %v4298_v4 = vld [vmem:[#allocation12 + $0x348] ss:$16 sps:$4 sm:$0xff]   ;;  %v4369_v12 = vld [vmem:[#allocation12 + $0x1ac] ss:$16 sps:$4 sm:$0xff]  }
 0x1df   :  { %1933 = vmatprep.subr.bf16.mxu0 %v4297_v14  ;;  %v4367_v14 = vld [vmem:[#allocation12 + $0x1a8] ss:$16 sps:$4 sm:$0xff]  }
 0x1e1   :  { %1987 = vmatpush1.bf16.msra.mxu1 %v4280_v15  ;;  %1934 = vmatpush1.bf16.msra.mxu0 %v4295_v16  ;;  %v4360_v15 = vld [vmem:[#allocation11 + $0x104] ss:$16 sps:$4 sm:$0xff]   ;;  %v4375_v16 = vld [vmem:[#allocation12 + $0x1cc] ss:$16 sps:$4 sm:$0xff]  }
 0x1e2   :  { %1988 = vmatprep.subr.bf16.mxu1 %v4288_v17  ;;  %1935 = vmatprep.subr.bf16.mxu0 %v4303_v18  ;;  %v4358_v17 = vld [vmem:[#allocation11 + $0x100] ss:$16 sps:$4 sm:$0xff]   ;;  %v4373_v18 = vld [vmem:[#allocation12 + $0x1c8] ss:$16 sps:$4 sm:$0xff]  }
 0x1e5   :  { %1989 = vmatpush1.bf16.msra.mxu1 %v4286_v19  ;;  %1936 = vmatpush1.bf16.msra.mxu0 %v4301_v20  ;;  %v4366_v19 = vld [vmem:[#allocation11 + $0x124] ss:$16 sps:$4 sm:$0xff]   ;;  %v4381_v20 = vld [vmem:[#allocation12 + $0x1ec] ss:$16 sps:$4 sm:$0xff]  }
 0x1e6   :  { %1990 = vmatprep.subr.bf16.mxu1 %v4294_v22  ;;  %1937 = vmatprep.subr.bf16.mxu0 %v4309_v23  ;;  %v833_v22 = vrot.slane %v5249_v55, %v5161_v52  ;;  %v4364_v23 = vld [vmem:[#allocation11 + $0x120] ss:$16 sps:$4 sm:$0xff]  }
 0x1e9   :  { %1991 = vmatpush1.bf16.msra.mxu1 %v4292_v25  ;;  %1938 = vmatpush1.bf16.msra.mxu0 %v4307_v26  ;;  %v4379_v25 = vld [vmem:[#allocation12 + $0x1e8] ss:$16 sps:$4 sm:$0xff]   ;;  %v4372_v26 = vld [vmem:[#allocation11 + $0x144] ss:$16 sps:$4 sm:$0xff]  }
 0x1ea   :  { %1992 = vmatprep.subr.bf16.mxu1 %v4300_v27  ;;  %1939 = vmatprep.subr.bf16.mxu0 %v4315_v28  ;;  %v4387_v27 = vld [vmem:[#allocation11 + $0x204] ss:$16 sps:$4 sm:$0xff]   ;;  %v977_v28 = vadd.f32 %v5238_v8, %v833_v22  ;;  %v4451_v22 = vld [vmem:[#allocation11 + $0x360] ss:$16 sps:$4 sm:$0xff]  }
 0x1eb   :  { %v4399_v8 = vld [vmem:[#allocation11 + $0x244] ss:$16 sps:$4 sm:$0xff]  }
 0x1ec   :  { %v5277_v38 = vpack.c.bf16 %v977_v28, %v977_v28  ;;  %v4465_v28 = vld [vmem:[#allocation11 + $0x3a4] ss:$16 sps:$4 sm:$0xff]  }
 0x1ed   :  { %1993 = vmatpush1.bf16.msra.mxu1 %v4298_v4  ;;  %1940 = vmatpush1.bf16.msra.mxu0 %v4313_v30  ;;  %v4370_v4 = vld [vmem:[#allocation11 + $0x140] ss:$16 sps:$4 sm:$0xff]  }
 0x1ee   :  { %1994 = vmatprep.subr.bf16.mxu1 %v4306_v33  ;;  %1941 = vmatprep.subr.bf16.mxu0 %v4321_v37  ;;  %v4385_v30 = vld [vmem:[#allocation11 + $0x200] ss:$16 sps:$4 sm:$0xff]   ;;  %v4378_v33 = vld [vmem:[#allocation11 + $0x164] ss:$16 sps:$4 sm:$0xff]  }
 0x1ef   :  { %v4393_v37 = vld [vmem:[#allocation11 + $0x224] ss:$16 sps:$4 sm:$0xff]  }
 0x1f1   :  { %1995 = vmatpush1.bf16.msra.mxu1 %v4304_v39  ;;  %1942 = vmatpush1.bf16.msra.mxu0 %v4319_v40  ;;  %v4376_v39 = vld [vmem:[#allocation11 + $0x160] ss:$16 sps:$4 sm:$0xff]  }
 0x1f2   :  { %2736 = vmatprep.subr.bf16.mxu1 %v4312_v42  ;;  %1943 = vmatprep.subr.bf16.mxu0 %v4327_v43  ;;  %v4391_v40 = vld [vmem:[#allocation11 + $0x220] ss:$16 sps:$4 sm:$0xff]   ;;  %v4384_v42 = vld [vmem:[#allocation11 + $0x184] ss:$16 sps:$4 sm:$0xff]  }
 0x1f3   :  { %v4382_v43 = vld [vmem:[#allocation11 + $0x180] ss:$16 sps:$4 sm:$0xff]  }
 0x1f4   :  { %2005 = vmatmul.mubr.bf16.vlgmr.msra.gmra.mrb[4].mxu1 %v1172_v13  ;;  %v4352_v13 = vld [vmem:[#allocation11 + $0xe0] ss:$16 sps:$4 sm:$0xff]  }
 0x1f5   :  { %2737 = vmatpush1.bf16.msra.mxu1 %v4310_v45  ;;  %1944 = vmatpush1.bf16.msra.mxu0 %v4325_v46  ;;  %v4390_v45 = vld [vmem:[#allocation11 + $0x1a4] ss:$16 sps:$4 sm:$0xff]  }
 0x1f6   :  { %2738 = vmatprep.subr.bf16.mxu1 %v4318_v48  ;;  %1945 = vmatprep.subr.bf16.mxu0 %v4333_v47  ;;  %v4405_v46 = vld [vmem:[#allocation11 + $0x264] ss:$16 sps:$4 sm:$0xff]   ;;  %v4403_v48 = vld [vmem:[#allocation11 + $0x260] ss:$16 sps:$4 sm:$0xff]  }
 0x1f7   :  { %2768 = vmatprep.mubr.bf16.mxu1 %v5271_v50  ;;  %v4396_v47 = vld [vmem:[#allocation11 + $0x1c4] ss:$16 sps:$4 sm:$0xff]  }
 0x1f9   :  { %2739 = vmatpush1.bf16.msra.mxu1 %v4316_v51  ;;  %1946 = vmatpush1.bf16.msra.mxu0 %v4331_v53  ;;  %v4411_v51 = vld [vmem:[#allocation11 + $0x284] ss:$16 sps:$4 sm:$0xff]   ;;  %v821_v53 = vrot.slane %v5249_v55, %v5139_v32  ;;  %v4406_v55 = vld [vmem:[#allocation11 + $0x400] ss:$16 sps:$4 sm:$0xff]  }
 0x1fa   :  { %2740 = vmatprep.subr.bf16.mxu1 %v4324_v56  ;;  %1947 = vmatprep.subr.bf16.mxu0 %v4339_v57  ;;  %v4394_v56 = vld [vmem:[#allocation11 + $0x1c0] ss:$16 sps:$4 sm:$0xff]  }
 0x1fb   :  { %v4409_v57 = vld [vmem:[#allocation11 + $0x280] ss:$16 sps:$4 sm:$0xff]  }
 0x1fd   :  { %2741 = vmatpush1.bf16.msra.mxu1 %v4322_v29  ;;  %1948 = vmatpush1.bf16.msra.mxu0 %v4337_v54  ;;  %v4402_v29 = vld [vmem:[#allocation11 + $0x1e4] ss:$16 sps:$4 sm:$0xff]  }
 0x1fe   :  { %2742 = vmatprep.subr.bf16.mxu1 %v4330_v58  ;;  %1949 = vmatprep.subr.bf16.mxu0 %v4345_v59  ;;  %v4417_v54 = vld [vmem:[#allocation11 + $0x2a4] ss:$16 sps:$4 sm:$0xff]   ;;  %v934_v58 = vadd.f32 %v5221_v24, %v821_v53  ;;  %v4400_v59 = vld [vmem:[#allocation11 + $0x1e0] ss:$16 sps:$4 sm:$0xff]   ;;  %v4472_v53 = vld [vmem:[#allocation11 + $0x2e8] ss:$16 sps:$4 sm:$0xff]  }
 0x1ff   :  { %v4412_v24 = vld [vmem:[#allocation11 + $0x420] ss:$16 sps:$4 sm:$0xff]  }
 0x201   :  { %2743 = vmatpush1.bf16.msra.mxu1 %v4328_v31  ;;  %1950 = vmatpush1.bf16.msra.mxu0 %v4343_v36  ;;  %v4415_v31 = vld [vmem:[#allocation11 + $0x2a0] ss:$16 sps:$4 sm:$0xff]   ;;  %v4408_v36 = vld [vmem:[#allocation11 + $0x404] ss:$16 sps:$4 sm:$0xff]  }
 0x202   :  { %2744 = vmatprep.subr.bf16.mxu1 %v4336_v63  ;;  %1951 = vmatprep.subr.bf16.mxu0 %v4351_v62  ;;  %v4423_v63 = vld [vmem:[#allocation11 + $0x2c4] ss:$16 sps:$4 sm:$0xff]   ;;  %v5284_v62 = vpack.c.bf16 %v934_v58, %v934_v58  ;;  %v4486_v58 = vld [vmem:[#allocation11 + $0x32c] ss:$16 sps:$4 sm:$0xff]  }
 0x205   :  { %2745 = vmatpush1.bf16.msra.mxu1 %v4334_v60  ;;  %1952 = vmatpush1.bf16.msra.mxu0 %v4349_v1  ;;  %v4421_v60 = vld [vmem:[#allocation11 + $0x2c0] ss:$16 sps:$4 sm:$0xff]   ;;  %v4414_v1 = vld [vmem:[#allocation11 + $0x424] ss:$16 sps:$4 sm:$0xff]  }
 0x206   :  { %2746 = vmatprep.subr.bf16.mxu1 %v4342_v3  ;;  %1953 = vmatprep.subr.bf16.mxu0 %v4357_v2  ;;  %v4429_v3 = vld [vmem:[#allocation11 + $0x2e4] ss:$16 sps:$4 sm:$0xff]   ;;  %v4427_v2 = vld [vmem:[#allocation11 + $0x2e0] ss:$16 sps:$4 sm:$0xff]  }
 0x209   :  { %2747 = vmatpush1.bf16.msra.mxu1 %v4340_v5  ;;  %1954 = vmatpush1.bf16.msra.mxu0 %v4355_v6  ;;  %v4420_v5 = vld [vmem:[#allocation11 + $0x444] ss:$16 sps:$4 sm:$0xff]  }
 0x20a   :  { %2748 = vmatprep.subr.bf16.mxu1 %v4348_v35  ;;  %1955 = vmatprep.subr.bf16.mxu0 %v4363_v7  ;;  %v4435_v6 = vld [vmem:[#allocation11 + $0x304] ss:$16 sps:$4 sm:$0xff]   ;;  %v4418_v35 = vld [vmem:[#allocation11 + $0x440] ss:$16 sps:$4 sm:$0xff]  }
 0x20b   :  { %v4433_v7 = vld [vmem:[#allocation11 + $0x300] ss:$16 sps:$4 sm:$0xff]  }
 0x20d   :  { %2749 = vmatpush1.bf16.msra.mxu1 %v4346_v9  ;;  %1956 = vmatpush1.bf16.msra.mxu0 %v4361_v10  ;;  %v4426_v9 = vld [vmem:[#allocation11 + $0x464] ss:$16 sps:$4 sm:$0xff]  }
 0x20e   :  { %2750 = vmatprep.subr.bf16.mxu1 %v4354_v11  ;;  %1957 = vmatprep.subr.bf16.mxu0 %v4369_v12  ;;  %v4441_v10 = vld [vmem:[#allocation11 + $0x324] ss:$16 sps:$4 sm:$0xff]   ;;  %v4424_v11 = vld [vmem:[#allocation11 + $0x460] ss:$16 sps:$4 sm:$0xff]  }
 0x20f   :  { %v4439_v12 = vld [vmem:[#allocation11 + $0x320] ss:$16 sps:$4 sm:$0xff]  }
 0x211   :  { %2751 = vmatpush1.bf16.msra.mxu1 %v4352_v13  ;;  %1958 = vmatpush1.bf16.msra.mxu0 %v4367_v14  ;;  %v4432_v13 = vld [vmem:[#allocation11 + $0x20c] ss:$16 sps:$4 sm:$0xff]   ;;  %v4447_v14 = vld [vmem:[#allocation11 + $0x344] ss:$16 sps:$4 sm:$0xff]  }
 0x212   :  { %2752 = vmatprep.subr.bf16.mxu1 %v4360_v15  ;;  %1959 = vmatprep.subr.bf16.mxu0 %v4375_v16  ;;  %v5290_v15 = vpack.c.bf16 %v5261_v61, %v5261_v61  ;;  %v4430_v16 = vld [vmem:[#allocation11 + $0x208] ss:$16 sps:$4 sm:$0xff]   ;;  %v4459_v61 = vld [vmem:[#allocation11 + $0x384] ss:$16 sps:$4 sm:$0xff]  }
 0x215   :  { %2753 = vmatpush1.bf16.msra.mxu1 %v4358_v17  ;;  %1960 = vmatpush1.bf16.msra.mxu0 %v4373_v18  ;;  %v4445_v17 = vld [vmem:[#allocation11 + $0x340] ss:$16 sps:$4 sm:$0xff]   ;;  %v4438_v18 = vld [vmem:[#allocation11 + $0x22c] ss:$16 sps:$4 sm:$0xff]  }
 0x216   :  { %2754 = vmatprep.subr.bf16.mxu1 %v4366_v19  ;;  %1961 = vmatprep.subr.bf16.mxu0 %v4381_v20  ;;  %v4453_v19 = vld [vmem:[#allocation11 + $0x364] ss:$16 sps:$4 sm:$0xff]   ;;  %v4436_v20 = vld [vmem:[#allocation11 + $0x228] ss:$16 sps:$4 sm:$0xff]  }
 0x219   :  { %2755 = vmatpush1.bf16.msra.mxu1 %v4364_v23  ;;  %1962 = vmatpush1.bf16.msra.mxu0 %v4379_v25  ;;  %v4444_v23 = vld [vmem:[#allocation11 + $0x24c] ss:$16 sps:$4 sm:$0xff]   ;;  %v4442_v25 = vld [vmem:[#allocation11 + $0x248] ss:$16 sps:$4 sm:$0xff]  }
 0x21a   :  { %2756 = vmatprep.subr.bf16.mxu1 %v4372_v26  ;;  %2777 = vmatprep.subr.bf16.mxu0 %v4387_v27  ;;  %v4457_v26 = vld [vmem:[#allocation11 + $0x380] ss:$16 sps:$4 sm:$0xff]   ;;  %v4450_v27 = vld [vmem:[#allocation11 + $0x26c] ss:$16 sps:$4 sm:$0xff]  }
 0x21c   :  { %1964 = vmatmul.mubr.bf16.vlgmr.msra.gmra.mrb[48].mxu0 %v5244_v21  ;;  %v4388_v21 = vld [vmem:[#allocation11 + $0x1a0] ss:$16 sps:$4 sm:$0xff]  }
 0x21d   :  { %2757 = vmatpush1.bf16.msra.mxu1 %v4370_v4  ;;  %2778 = vmatpush1.bf16.msra.mxu0 %v4385_v30  ;;  %v4448_v4 = vld [vmem:[#allocation11 + $0x268] ss:$16 sps:$4 sm:$0xff]   ;;  %v4463_v30 = vld [vmem:[#allocation11 + $0x3a0] ss:$16 sps:$4 sm:$0xff]  }
 0x21e   :  { %2758 = vmatprep.subr.bf16.mxu1 %v4378_v33  ;;  %2779 = vmatprep.subr.bf16.mxu0 %v4393_v37  ;;  %v4456_v33 = vld [vmem:[#allocation11 + $0x28c] ss:$16 sps:$4 sm:$0xff]   ;;  %v4471_v37 = vld [vmem:[#allocation11 + $0x3c4] ss:$16 sps:$4 sm:$0xff]  }
 0x21f   :  { %2809 = vmatprep.mubr.bf16.mxu0 %v5277_v38 }
 0x221   :  { %2759 = vmatpush1.bf16.msra.mxu1 %v4376_v39  ;;  %2780 = vmatpush1.bf16.msra.mxu0 %v4391_v40  ;;  %v4454_v39 = vld [vmem:[#allocation11 + $0x288] ss:$16 sps:$4 sm:$0xff]   ;;  %v4462_v40 = vld [vmem:[#allocation11 + $0x2ac] ss:$16 sps:$4 sm:$0xff]  }
 0x222   :  { %2760 = vmatprep.subr.bf16.mxu1 %v4384_v42  ;;  %2781 = vmatprep.subr.bf16.mxu0 %v4399_v8  ;;  %v4477_v42 = vld [vmem:[#allocation11 + $0x3e4] ss:$16 sps:$4 sm:$0xff]   ;;  %v4460_v8 = vld [vmem:[#allocation11 + $0x2a8] ss:$16 sps:$4 sm:$0xff]  }
 0x225   :  { %2761 = vmatpush1.bf16.msra.mxu1 %v4382_v43  ;;  %2782 = vmatpush1.bf16.msra.mxu0 %v4397_v44  ;;  %v4475_v43 = vld [vmem:[#allocation11 + $0x3e0] ss:$16 sps:$4 sm:$0xff]   ;;  %v4468_v44 = vld [vmem:[#allocation11 + $0x2cc] ss:$16 sps:$4 sm:$0xff]  }
 0x226   :  { %2762 = vmatprep.subr.bf16.mxu1 %v4390_v45  ;;  %2783 = vmatprep.subr.bf16.mxu0 %v4405_v46  ;;  %v4483_v45 = vld [vmem:[#allocation11 + $0xc] ss:$16 sps:$4 sm:$0xff]   ;;  %v5297_v46 = vpack.c.bf16 %v5254_v41, %v5254_v41 }
 0x227   :  { %v4495_v41 = vld [vmem:[#allocation11 + $0x4c] ss:$16 sps:$4 sm:$0xff]  }
 0x229   :  { %2763 = vmatpush1.bf16.msra.mxu1 %v4388_v21  ;;  %2784 = vmatpush1.bf16.msra.mxu0 %v4403_v48  ;;  %v4466_v21 = vld [vmem:[#allocation11 + $0x2c8] ss:$16 sps:$4 sm:$0xff]  }
 0x22a   :  { %2764 = vmatprep.subr.bf16.mxu1 %v4396_v47  ;;  %2785 = vmatprep.subr.bf16.mxu0 %v4411_v51  ;;  %v4481_v48 = vld [vmem:[#allocation11 + $0x8] ss:$16 sps:$4 sm:$0xff]   ;;  %v4474_v47 = vld [vmem:[#allocation11 + $0x2ec] ss:$16 sps:$4 sm:$0xff]  }
 0x22b   :  { %v4489_v51 = vld [vmem:[#allocation11 + $0x2c] ss:$16 sps:$4 sm:$0xff]  }
 0x22d   :  { %2765 = vmatpush1.bf16.msra.mxu1 %v4394_v56  ;;  %2786 = vmatpush1.bf16.msra.mxu0 %v4409_v57  ;;  %v4487_v56 = vld [vmem:[#allocation11 + $0x28] ss:$16 sps:$4 sm:$0xff]   ;;  %v4480_v57 = vld [vmem:[#allocation11 + $0x30c] ss:$16 sps:$4 sm:$0xff]  }
 0x22e   :  { %2766 = vmatprep.subr.bf16.mxu1 %v4402_v29  ;;  %2787 = vmatprep.subr.bf16.mxu0 %v4417_v54  ;;  %v4478_v29 = vld [vmem:[#allocation11 + $0x308] ss:$16 sps:$4 sm:$0xff]  }
 0x22f   :  { %v4493_v54 = vld [vmem:[#allocation11 + $0x48] ss:$16 sps:$4 sm:$0xff]  }
 0x231   :  { %2767 = vmatpush1.bf16.msra.mxu1 %v4400_v59  ;;  %2788 = vmatpush1.bf16.msra.mxu0 %v4415_v31  ;;  %v4501_v59 = vld [vmem:[#allocation11 + $0x6c] ss:$16 sps:$4 sm:$0xff]   ;;  %v4484_v31 = vld [vmem:[#allocation11 + $0x328] ss:$16 sps:$4 sm:$0xff]  }
 0x232   :  { %2818 = vmatprep.subr.bf16.mxu1 %v4408_v36  ;;  %2789 = vmatprep.subr.bf16.mxu0 %v4423_v63  ;;  %v4499_v36 = vld [vmem:[#allocation11 + $0x68] ss:$16 sps:$4 sm:$0xff]   ;;  %v4492_v63 = vld [vmem:[#allocation11 + $0x34c] ss:$16 sps:$4 sm:$0xff]  }
 0x234   :  { %2769 = vmatmul.mubr.bf16.vlgmr.msra.gmra.mrb[8].mxu1 %v5284_v62 }
 0x235   :  { %2819 = vmatpush1.bf16.msra.mxu1 %v4406_v55  ;;  %2790 = vmatpush1.bf16.msra.mxu0 %v4421_v60  ;;  %v4507_v55 = vld [vmem:[#allocation11 + $0x8c] ss:$16 sps:$4 sm:$0xff]   ;;  %v4505_v60 = vld [vmem:[#allocation11 + $0x88] ss:$16 sps:$4 sm:$0xff]  }
 0x236   :  { %2820 = vmatprep.subr.bf16.mxu1 %v4414_v1  ;;  %2791 = vmatprep.subr.bf16.mxu0 %v4429_v3  ;;  %v4498_v1 = vld [vmem:[#allocation11 + $0x36c] ss:$16 sps:$4 sm:$0xff]  }
 0x237   :  { %2850 = vmatprep.mubr.bf16.mxu1 %v4900_v0  ;;  %v4513_v3 = vld [vmem:[#allocation11 + $0xac] ss:$16 sps:$4 sm:$0xff]  }
 0x239   :  { %2821 = vmatpush1.bf16.msra.mxu1 %v4412_v24  ;;  %2792 = vmatpush1.bf16.msra.mxu0 %v4427_v2  ;;  %v4496_v24 = vld [vmem:[#allocation11 + $0x368] ss:$16 sps:$4 sm:$0xff]  }
 0x23a   :  { %2822 = vmatprep.subr.bf16.mxu1 %v4420_v5  ;;  %2793 = vmatprep.subr.bf16.mxu0 %v4435_v6  ;;  %v4511_v2 = vld [vmem:[#allocation11 + $0xa8] ss:$16 sps:$4 sm:$0xff]   ;;  %v4504_v5 = vld [vmem:[#allocation11 + $0x38c] ss:$16 sps:$4 sm:$0xff]  }
 0x23b   :  { %v4519_v6 = vld [vmem:[#allocation11 + $0xcc] ss:$16 sps:$4 sm:$0xff]  }
 0x23d   :  { %2823 = vmatpush1.bf16.msra.mxu1 %v4418_v35  ;;  %2794 = vmatpush1.bf16.msra.mxu0 %v4433_v7  ;;  %v4502_v35 = vld [vmem:[#allocation11 + $0x388] ss:$16 sps:$4 sm:$0xff]  }
 0x23e   :  { %2824 = vmatprep.subr.bf16.mxu1 %v4426_v9  ;;  %2795 = vmatprep.subr.bf16.mxu0 %v4441_v10  ;;  %v4517_v7 = vld [vmem:[#allocation11 + $0xc8] ss:$16 sps:$4 sm:$0xff]   ;;  %v4510_v9 = vld [vmem:[#allocation11 + $0x3ac] ss:$16 sps:$4 sm:$0xff]  }
 0x23f   :  { %v4525_v10 = vld [vmem:[#allocation11 + $0xec] ss:$16 sps:$4 sm:$0xff]  }
 0x241   :  { %2825 = vmatpush1.bf16.msra.mxu1 %v4424_v11  ;;  %2796 = vmatpush1.bf16.msra.mxu0 %v4439_v12  ;;  %v4508_v11 = vld [vmem:[#allocation11 + $0x3a8] ss:$16 sps:$4 sm:$0xff]  }
 0x242   :  { %2900 = vmatprep.subr.bf16.mxu1 %v4432_v13  ;;  %2797 = vmatprep.subr.bf16.mxu0 %v4447_v14  ;;  %v4523_v12 = vld [vmem:[#allocation11 + $0xe8] ss:$16 sps:$4 sm:$0xff]   ;;  %v4516_v13 = vld [vmem:[#allocation11 + $0x3cc] ss:$16 sps:$4 sm:$0xff]  }
 0x243   :  { %v4528_v14 = vld [vmem:[#allocation11 + $0x10c] ss:$16 sps:$4 sm:$0xff]  }
 0x244   :  { %3994 = vmatmul.mubr.msk.bf16.vlgmr.msra.gmra.mrb[12].mxu1 %vm160_vm0, %v5290_v15 }
 0x245   :  { %2901 = vmatpush1.bf16.msra.mxu1 %v4430_v16  ;;  %2798 = vmatpush1.bf16.msra.mxu0 %v4445_v17  ;;  %v4514_v16 = vld [vmem:[#allocation11 + $0x3c8] ss:$16 sps:$4 sm:$0xff]  }
 0x246   :  { %2902 = vmatprep.subr.bf16.mxu1 %v4438_v18  ;;  %2799 = vmatprep.subr.bf16.mxu0 %v4453_v19  ;;  %v4526_v17 = vld [vmem:[#allocation11 + $0x108] ss:$16 sps:$4 sm:$0xff]   ;;  %v4522_v18 = vld [vmem:[#allocation11 + $0x3ec] ss:$16 sps:$4 sm:$0xff]  }
 0x247   :  { %2932 = vmatprep.mubr.bf16.mxu1 %v5277_v38  ;;  %v4469_v38 = vld [vmem:[#allocation11 + $0x3c0] ss:$16 sps:$4 sm:$0xff]   ;;  %v4531_v19 = vld [vmem:[#allocation11 + $0x12c] ss:$16 sps:$4 sm:$0xff]  }
 0x249   :  { %2903 = vmatpush1.bf16.msra.mxu1 %v4436_v20  ;;  %2800 = vmatpush1.bf16.msra.mxu0 %v4451_v22  ;;  %v4520_v20 = vld [vmem:[#allocation11 + $0x3e8] ss:$16 sps:$4 sm:$0xff]  }
 0x24a   :  { %2904 = vmatprep.subr.bf16.mxu1 %v4444_v23  ;;  %2801 = vmatprep.subr.bf16.mxu0 %v4459_v61  ;;  %v4529_v22 = vld [vmem:[#allocation11 + $0x128] ss:$16 sps:$4 sm:$0xff]   ;;  %v4534_v23 = vld [vmem:[#allocation11 + $0x14c] ss:$16 sps:$4 sm:$0xff]  }
 0x24b   :  { %v4564_v61 = vld [vmem:[#allocation14 + $0x4] ss:$8 sps:$4 sm:$0xff]  }
 0x24d   :  { %2905 = vmatpush1.bf16.msra.mxu1 %v4442_v25  ;;  %2802 = vmatpush1.bf16.msra.mxu0 %v4457_v26  ;;  %v4532_v25 = vld [vmem:[#allocation11 + $0x148] ss:$16 sps:$4 sm:$0xff]  }
 0x24e   :  { %2906 = vmatprep.subr.bf16.mxu1 %v4450_v27  ;;  %2803 = vmatprep.subr.bf16.mxu0 %v4465_v28  ;;  %v4562_v26 = vld [vmem:[#allocation14] ss:$8 sps:$4 sm:$0xff]   ;;  %v4537_v27 = vld [vmem:[#allocation11 + $0x16c] ss:$16 sps:$4 sm:$0xff]  }
 0x24f   :  { %v4535_v28 = vld [vmem:[#allocation11 + $0x168] ss:$16 sps:$4 sm:$0xff]  }
 0x251   :  { %2907 = vmatpush1.bf16.msra.mxu1 %v4448_v4  ;;  %2804 = vmatpush1.bf16.msra.mxu0 %v4463_v30  ;;  %v4540_v4 = vld [vmem:[#allocation11 + $0x18c] ss:$16 sps:$4 sm:$0xff]   ;;  %v4538_v30 = vld [vmem:[#allocation11 + $0x188] ss:$16 sps:$4 sm:$0xff]  }
 0x252   :  { %2908 = vmatprep.subr.bf16.mxu1 %v4456_v33  ;;  %2805 = vmatprep.subr.bf16.mxu0 %v4471_v37  ;;  %v4565_v33 = vld [vmem:[#allocation14 + $0x10] ss:$8 sps:$4 sm:$0xff]   ;;  %v4567_v37 = vld [vmem:[#allocation14 + $0x14] ss:$8 sps:$4 sm:$0xff]  }
 0x255   :  { %2909 = vmatpush1.bf16.msra.mxu1 %v4454_v39  ;;  %2806 = vmatpush1.bf16.msra.mxu0 %v4469_v38  ;;  %v4543_v39 = vld [vmem:[#allocation11 + $0x1ac] ss:$16 sps:$4 sm:$0xff]  }
 0x256   :  { %2910 = vmatprep.subr.bf16.mxu1 %v4462_v40  ;;  %2807 = vmatprep.subr.bf16.mxu0 %v4477_v42  ;;  %v4570_v38 = vld [vmem:[#allocation14 + $0x24] ss:$8 sps:$4 sm:$0xff]   ;;  %v4568_v40 = vld [vmem:[#allocation14 + $0x20] ss:$8 sps:$4 sm:$0xff]  }
 0x257   :  { %v4541_v42 = vld [vmem:[#allocation11 + $0x1a8] ss:$16 sps:$4 sm:$0xff]  }
 0x259   :  { %2911 = vmatpush1.bf16.msra.mxu1 %v4460_v8  ;;  %2808 = vmatpush1.bf16.msra.mxu0 %v4475_v43  ;;  %v4573_v8 = vld [vmem:[#allocation14 + $0x34] ss:$8 sps:$4 sm:$0xff]  }
 0x25a   :  { %2912 = vmatprep.subr.bf16.mxu1 %v4468_v44  ;;  %2859 = vmatprep.subr.bf16.mxu0 %v4483_v45  ;;  %v4546_v43 = vld [vmem:[#allocation11 + $0x1cc] ss:$16 sps:$4 sm:$0xff]   ;;  %v4571_v44 = vld [vmem:[#allocation14 + $0x30] ss:$8 sps:$4 sm:$0xff]  }
 0x25b   :  { %v4544_v45 = vld [vmem:[#allocation11 + $0x1c8] ss:$16 sps:$4 sm:$0xff]  }
 0x25c   :  { %2810 = vmatmul.mubr.bf16.vlgmr.msra.gmra.mrb[52].mxu0 %v5297_v46 }
 0x25d   :  { %2913 = vmatpush1.bf16.msra.mxu1 %v4466_v21  ;;  %2860 = vmatpush1.bf16.msra.mxu0 %v4481_v48  ;;  %v4549_v21 = vld [vmem:[#allocation11 + $0x1ec] ss:$16 sps:$4 sm:$0xff]   ;;  %v4574_v48 = vld [vmem:[#allocation14 + $0x40] ss:$8 sps:$4 sm:$0xff]  }
 0x25e   :  { %2914 = vmatprep.subr.bf16.mxu1 %v4474_v47  ;;  %2891 = vmatprep.mubr.bf16.mxu0 %v5271_v50  ;;  %v4490_v50 = vld [vmem:[#allocation11 + $0x348] ss:$16 sps:$4 sm:$0xff]  }
 0x25f   :  { %2861 = vmatprep.subr.bf16.mxu0 %v4489_v51  ;;  %v4547_v47 = vld [vmem:[#allocation11 + $0x1e8] ss:$16 sps:$4 sm:$0xff]   ;;  %v4579_v51 = vld [vmem:[#allocation14 + $0x54] ss:$8 sps:$4 sm:$0xff]  }
 0x261   :  { %2915 = vmatpush1.bf16.msra.mxu1 %v4472_v53  ;;  %2862 = vmatpush1.bf16.msra.mxu0 %v4487_v56  ;;  %v4552_v53 = vld [vmem:[#allocation11 + $0x40c] ss:$16 sps:$4 sm:$0xff]  }
 0x262   :  { %2916 = vmatprep.subr.bf16.mxu1 %v4480_v57  ;;  %2863 = vmatprep.subr.bf16.mxu0 %v4495_v41  ;;  %v4577_v41 = vld [vmem:[#allocation14 + $0x50] ss:$8 sps:$4 sm:$0xff]  }
 0x265   :  { %2917 = vmatpush1.bf16.msra.mxu1 %v4478_v29  ;;  %2864 = vmatpush1.bf16.msra.mxu0 %v4493_v54  ;;  %v4550_v54 = vld [vmem:[#allocation11 + $0x408] ss:$16 sps:$4 sm:$0xff]  }
 0x266   :  { %2918 = vmatprep.subr.bf16.mxu1 %v4486_v58  ;;  %2865 = vmatprep.subr.bf16.mxu0 %v4501_v59  ;;  %v4555_v59 = vld [vmem:[#allocation11 + $0x42c] ss:$16 sps:$4 sm:$0xff]  }
 0x269   :  { %2919 = vmatpush1.bf16.msra.mxu1 %v4484_v31  ;;  %2866 = vmatpush1.bf16.msra.mxu0 %v4499_v36  ;;  %v4582_v31 = vld [vmem:[#allocation14 + $0x64] ss:$8 sps:$4 sm:$0xff]   ;;  %v4580_v36 = vld [vmem:[#allocation14 + $0x60] ss:$8 sps:$4 sm:$0xff]  }
 0x26a   :  { %2920 = vmatprep.subr.bf16.mxu1 %v4492_v63  ;;  %2867 = vmatprep.subr.bf16.mxu0 %v4507_v55  ;;  %v4553_v63 = vld [vmem:[#allocation11 + $0x428] ss:$16 sps:$4 sm:$0xff]   ;;  %v4585_v55 = vld [vmem:[#allocation14 + $0x74] ss:$8 sps:$4 sm:$0xff]  }
 0x26d   :  { %2921 = vmatpush1.bf16.msra.mxu1 %v4490_v50  ;;  %2868 = vmatpush1.bf16.msra.mxu0 %v4505_v60  ;;  %v4558_v50 = vld [vmem:[#allocation11 + $0x44c] ss:$16 sps:$4 sm:$0xff]   ;;  %v4583_v60 = vld [vmem:[#allocation14 + $0x70] ss:$8 sps:$4 sm:$0xff]  }
 0x26e   :  { %2922 = vmatprep.subr.bf16.mxu1 %v4498_v1  ;;  %2869 = vmatprep.subr.bf16.mxu0 %v4513_v3  ;;  %v4556_v1 = vld [vmem:[#allocation11 + $0x448] ss:$16 sps:$4 sm:$0xff]   ;;  %v4588_v3 = vld [vmem:[#allocation14 + $0x84] ss:$8 sps:$4 sm:$0xff]  }
 0x271   :  { %2923 = vmatpush1.bf16.msra.mxu1 %v4496_v24  ;;  %2870 = vmatpush1.bf16.msra.mxu0 %v4511_v2  ;;  %v4561_v24 = vld [vmem:[#allocation11 + $0x46c] ss:$16 sps:$4 sm:$0xff]   ;;  %v4559_v2 = vld [vmem:[#allocation11 + $0x468] ss:$16 sps:$4 sm:$0xff]  }
 0x272   :  { %2924 = vmatprep.subr.bf16.mxu1 %v4504_v5  ;;  %2871 = vmatprep.subr.bf16.mxu0 %v4519_v6  ;;  %v4591_v5 = vld [vmem:[#allocation14 + $0x94] ss:$8 sps:$4 sm:$0xff]   ;;  %v4594_v6 = vld [vmem:[#allocation14 + $0xa4] ss:$8 sps:$4 sm:$0xff]  }
 0x275   :  { %2925 = vmatpush1.bf16.msra.mxu1 %v4502_v35  ;;  %2872 = vmatpush1.bf16.msra.mxu0 %v4517_v7  ;;  %v4592_v35 = vld [vmem:[#allocation14 + $0xa0] ss:$8 sps:$4 sm:$0xff]   ;;  %v4597_v7 = vld [vmem:[#allocation14 + $0xb4] ss:$8 sps:$4 sm:$0xff]  }
 0x276   :  { %2926 = vmatprep.subr.bf16.mxu1 %v4510_v9  ;;  %2873 = vmatprep.subr.bf16.mxu0 %v4525_v10 }
 0x279   :  { %2927 = vmatpush1.bf16.msra.mxu1 %v4508_v11  ;;  %2874 = vmatpush1.bf16.msra.mxu0 %v4523_v12  ;;  %v4595_v12 = vld [vmem:[#allocation14 + $0xb0] ss:$8 sps:$4 sm:$0xff]  }
 0x27a   :  { %2928 = vmatprep.subr.bf16.mxu1 %v4516_v13  ;;  %2875 = vmatprep.subr.bf16.mxu0 %v4528_v14 }
 0x27d   :  { %2929 = vmatpush1.bf16.msra.mxu1 %v4514_v16  ;;  %2876 = vmatpush1.bf16.msra.mxu0 %v4526_v17  ;;  %v4600_v16 = vld [vmem:[#allocation14 + $0xc4] ss:$8 sps:$4 sm:$0xff]  }
 0x27e   :  { %2930 = vmatprep.subr.bf16.mxu1 %v4522_v18  ;;  %2877 = vmatprep.subr.bf16.mxu0 %v4531_v19  ;;  %v4598_v18 = vld [vmem:[#allocation14 + $0xc0] ss:$8 sps:$4 sm:$0xff]   ;;  %v4603_v19 = vld [vmem:[#allocation14 + $0xd4] ss:$8 sps:$4 sm:$0xff]  }
 0x281   :  { %2931 = vmatpush1.bf16.msra.mxu1 %v4520_v20  ;;  %2878 = vmatpush1.bf16.msra.mxu0 %v4529_v22  ;;  %v4606_v20 = vld [vmem:[#allocation14 + $0xe4] ss:$8 sps:$4 sm:$0xff]   ;;  %v4604_v22 = vld [vmem:[#allocation14 + $0xe0] ss:$8 sps:$4 sm:$0xff]  }
 0x282   :  { %2879 = vmatprep.subr.bf16.mxu0 %v4534_v23  ;;  %3412 = vmatprep.subr.bf16.mxu1 %v4564_v61  ;;  %v4609_v23 = vld [vmem:[#allocation14 + $0xf4] ss:$8 sps:$4 sm:$0xff]   ;;  %v4607_v61 = vld [vmem:[#allocation14 + $0xf0] ss:$8 sps:$4 sm:$0xff]  }
 0x284   :  { %2933 = vmatmul.mubr.bf16.vlgmr.msra.gmra.mrb[16].mxu1 %v5297_v46  ;;  %v4576_v46 = vld [vmem:[#allocation14 + $0x44] ss:$8 sps:$4 sm:$0xff]  }
 0x285   :  { %2880 = vmatpush1.bf16.msra.mxu0 %v4532_v25  ;;  %3413 = vmatpush1.bf16.msra.mxu1 %v4562_v26  ;;  %v4612_v25 = vld [vmem:[#allocation14 + $0x104] ss:$8 sps:$4 sm:$0xff]  }
 0x286   :  { %2881 = vmatprep.subr.bf16.mxu0 %v4537_v27  ;;  %3414 = vmatprep.subr.bf16.mxu1 %v4567_v37 }
 0x289   :  { %2882 = vmatpush1.bf16.msra.mxu0 %v4535_v28  ;;  %3415 = vmatpush1.bf16.msra.mxu1 %v4565_v33 }
 0x28a   :  { %2883 = vmatprep.subr.bf16.mxu0 %v4540_v4  ;;  %3416 = vmatprep.subr.bf16.mxu1 %v4570_v38 }
 0x28d   :  { %2884 = vmatpush1.bf16.msra.mxu0 %v4538_v30  ;;  %3417 = vmatpush1.bf16.msra.mxu1 %v4568_v40 }
 0x28e   :  { %2885 = vmatprep.subr.bf16.mxu0 %v4543_v39  ;;  %3418 = vmatprep.subr.bf16.mxu1 %v4573_v8 }
 0x291   :  { %2886 = vmatpush1.bf16.msra.mxu0 %v4541_v42  ;;  %3419 = vmatpush1.bf16.msra.mxu1 %v4571_v44 }
 0x292   :  { %2887 = vmatprep.subr.bf16.mxu0 %v4546_v43  ;;  %3420 = vmatprep.subr.bf16.mxu1 %v4576_v46 }
 0x295   :  { %2888 = vmatpush1.bf16.msra.mxu0 %v4544_v45  ;;  %3421 = vmatpush1.bf16.msra.mxu1 %v4574_v48  ;;  %v4659_v48 = vld [vmem:[#allocation15] sm:$0xff]  }
 0x296   :  { %2889 = vmatprep.subr.bf16.mxu0 %v4549_v21  ;;  %3422 = vmatprep.subr.bf16.mxu1 %v4579_v51  ;;  %v4658_v21 = vld [vmem:[#allocation15 + $0x40] sm:$0xff]   ;;  %v4661_v51 = vld [vmem:[#allocation15 + $0x8] sm:$0xff]  }
 0x297   :  { %v1883_v56 = vpop.f32.mrb[0].mxu1 }
 0x298   :  { %v1885_v57 = vpop.f32.mrb[1].mxu1 }
 0x299   :  { %v1887_v29 = vpop.f32.mrb[2].mxu1  ;;  %2890 = vmatpush1.bf16.msra.mxu0 %v4547_v47  ;;  %3423 = vmatpush1.bf16.msra.mxu1 %v4577_v41  ;;  %v4660_v47 = vld [vmem:[#allocation15 + $0x48] sm:$0xff]   ;;  %v4665_v41 = vld [vmem:[#allocation15 + $0x18] sm:$0xff]  }
 0x29a   :  { %v1888_v58 = vpop.f32.mrb[3].mxu1  ;;  %2941 = vmatprep.subr.bf16.mxu0 %v4552_v53  ;;  %3424 = vmatprep.subr.bf16.mxu1 %v4582_v31  ;;  %v4662_v53 = vld [vmem:[#allocation15 + $0x50] sm:$0xff]   ;;  %v4666_v29 = vld [vmem:[#allocation15 + $0x60] sm:$0xff]  }
 0x29b   :  { %v4667_v31 = vld [vmem:[#allocation15 + $0x20] sm:$0xff]  }
 0x29c   :  { %2892 = vmatmul.mubr.bf16.vlgmr.msra.gmra.mrb[56].mxu0 %v5284_v62  ;;  %v4586_v62 = vld [vmem:[#allocation14 + $0x80] ss:$8 sps:$4 sm:$0xff]  }
 0x29d   :  { %2942 = vmatpush1.bf16.msra.mxu0 %v4550_v54  ;;  %2973 = vmatprep.mubr.bf16.mxu0 %v4900_v0  ;;  %v4589_v0 = vld [vmem:[#allocation14 + $0x90] ss:$8 sps:$4 sm:$0xff]  }
 0x29e   :  { %2943 = vmatprep.subr.bf16.mxu0 %v4555_v59  ;;  %3425 = vmatpush1.bf16.msra.mxu1 %v4580_v36 }
 0x29f   :  { %3426 = vmatprep.subr.bf16.mxu1 %v4585_v55  ;;  %v4669_v55 = vld [vmem:[#allocation15 + $0x28] sm:$0xff]  }
 0x2a1   :  { %2944 = vmatpush1.bf16.msra.mxu0 %v4553_v63  ;;  %v4668_v63 = vld [vmem:[#allocation15 + $0x68] sm:$0xff]  }
 0x2a2   :  { %2945 = vmatprep.subr.bf16.mxu0 %v4558_v50  ;;  %3427 = vmatpush1.bf16.msra.mxu1 %v4583_v60  ;;  %v5313_v50 = vld [vmem:[%s5353_s8] sm:$0xf] }
 0x2a3   :  { %3428 = vmatprep.subr.bf16.mxu1 %v4588_v3 }
 0x2a5   :  { %2946 = vmatpush1.bf16.msra.mxu0 %v4556_v1 }
 0x2a6   :  { %2947 = vmatprep.subr.bf16.mxu0 %v4561_v24  ;;  %3429 = vmatpush1.bf16.msra.mxu1 %v4586_v62  ;;  %v2987_v24 = vrot.slane %v5313_v50, %v5139_v32 }
 0x2a7   :  { %3430 = vmatprep.subr.bf16.mxu1 %v4591_v5  ;;  %v2991_v5 = vrot.slane %v5313_v50, %v5145_v34 }
 0x2a9   :  { %2948 = vmatpush1.bf16.msra.mxu0 %v4559_v2 }
 0x2aa   :  { %3431 = vmatpush1.bf16.msra.mxu1 %v4589_v0  ;;  %4080 = vmatprep.subr.bf16.mxu0 %v4658_v21  ;;  %v4645_v21 = vld [vmem:[#allocation14 + $0x1b4] ss:$8 sps:$4 sm:$0xff]  }
 0x2ab   :  { %3432 = vmatprep.subr.bf16.mxu1 %v4594_v6 }
 0x2ac   :  { %3995 = vmatmul.mubr.msk.bf16.vlgmr.msra.gmra.mrb[60].mxu0 %vm160_vm0, %v5290_v15  ;;  %v4601_v15 = vld [vmem:[#allocation14 + $0xd0] ss:$8 sps:$4 sm:$0xff]  }
 0x2ad   :  { %4081 = vmatpush3.bf16.msra.mxu0 %v4659_v48  ;;  %v4643_v48 = vld [vmem:[#allocation14 + $0x1b0] ss:$8 sps:$4 sm:$0xff]  }
 0x2ae   :  { %3433 = vmatpush1.bf16.msra.mxu1 %v4592_v35  ;;  %4082 = vmatprep.subr.bf16.mxu0 %v4660_v47  ;;  %v4648_v47 = vld [vmem:[#allocation14 + $0x1c4] ss:$8 sps:$4 sm:$0xff]  }
 0x2af   :  { %v1924_v9 = vpop.f32.mrb[44].mxu0  ;;  %3434 = vmatprep.subr.bf16.mxu1 %v4597_v7 }
 0x2b0   :  { %v1925_v10 = vadd.f32 %v1924_v9, %v1883_v56  ;;  %v1926_v11 = vpop.f32.mrb[45].mxu0  ;;  %v4663_v56 = vld [vmem:[#allocation15 + $0x10] sm:$0xff]  }
 0x2b1   :  { %v1927_v13 = vadd.f32 %v1926_v11, %v1885_v57  ;;  %v1928_v14 = vpop.f32.mrb[46].mxu0  ;;  %4083 = vmatpush3.bf16.msra.mxu0 %v4661_v51  ;;  %v4664_v57 = vld [vmem:[#allocation15 + $0x58] sm:$0xff]   ;;  %v4646_v51 = vld [vmem:[#allocation14 + $0x1c0] ss:$8 sps:$4 sm:$0xff]  }
 0x2b2   :  { %v1929_v17 = vpop.f32.mrb[47].mxu0  ;;  %3435 = vmatpush1.bf16.msra.mxu1 %v4595_v12  ;;  %4084 = vmatprep.subr.bf16.mxu0 %v4662_v53  ;;  %v4651_v53 = vld [vmem:[#allocation14 + $0x1d4] ss:$8 sps:$4 sm:$0xff]  }
 0x2b3   :  { %3436 = vmatprep.subr.bf16.mxu1 %v4600_v16  ;;  %v4615_v16 = vld [vmem:[#allocation14 + $0x114] ss:$8 sps:$4 sm:$0xff]   ;;  %v4613_v17 = vld [vmem:[#allocation14 + $0x110] ss:$8 sps:$4 sm:$0xff]  }
 0x2b5   :  { %4085 = vmatpush3.bf16.msra.mxu0 %v4663_v56  ;;  %v4649_v56 = vld [vmem:[#allocation14 + $0x1d0] ss:$8 sps:$4 sm:$0xff]  }
 0x2b6   :  { %3437 = vmatpush1.bf16.msra.mxu1 %v4598_v18  ;;  %4086 = vmatprep.subr.bf16.mxu0 %v4664_v57  ;;  %v4618_v18 = vld [vmem:[#allocation14 + $0x124] ss:$8 sps:$4 sm:$0xff]  }
 0x2b7   :  { %3438 = vmatprep.subr.bf16.mxu1 %v4603_v19  ;;  %v4616_v19 = vld [vmem:[#allocation14 + $0x120] ss:$8 sps:$4 sm:$0xff]   ;;  %v4654_v57 = vld [vmem:[#allocation14 + $0x1e4] ss:$8 sps:$4 sm:$0xff]  }
 0x2b9   :  { %4087 = vmatpush3.bf16.msra.mxu0 %v4665_v41 }
 0x2ba   :  { %3439 = vmatpush1.bf16.msra.mxu1 %v4601_v15  ;;  %4088 = vmatprep.subr.bf16.mxu0 %v4666_v29  ;;  %v4621_v15 = vld [vmem:[#allocation14 + $0x134] ss:$8 sps:$4 sm:$0xff]  }
 0x2bb   :  { %3440 = vmatprep.subr.bf16.mxu1 %v4606_v20  ;;  %v4619_v20 = vld [vmem:[#allocation14 + $0x130] ss:$8 sps:$4 sm:$0xff]  }
 0x2bd   :  { %4089 = vmatpush3.bf16.msra.mxu0 %v4667_v31  ;;  %v4652_v31 = vld [vmem:[#allocation14 + $0x1e0] ss:$8 sps:$4 sm:$0xff]  }
 0x2be   :  { %3441 = vmatpush1.bf16.msra.mxu1 %v4604_v22  ;;  %4090 = vmatprep.subr.bf16.mxu0 %v4668_v63  ;;  %v4624_v22 = vld [vmem:[#allocation14 + $0x144] ss:$8 sps:$4 sm:$0xff]  }
 0x2bf   :  { %3442 = vmatprep.subr.bf16.mxu1 %v4609_v23  ;;  %v4622_v23 = vld [vmem:[#allocation14 + $0x140] ss:$8 sps:$4 sm:$0xff]  }
 0x2c1   :  { %4091 = vmatpush3.bf16.msra.mxu0 %v4669_v55  ;;  %v4657_v55 = vld [vmem:[#allocation14 + $0x1f4] ss:$8 sps:$4 sm:$0xff]  }
 0x2c2   :  { %3443 = vmatpush1.bf16.msra.mxu1 %v4607_v61  ;;  %v4627_v61 = vld [vmem:[#allocation14 + $0x154] ss:$8 sps:$4 sm:$0xff]  }
 0x2c3   :  { %3453 = vmatprep.subr.bf16.mxu1 %v4612_v25  ;;  %v4625_v25 = vld [vmem:[#allocation14 + $0x150] ss:$8 sps:$4 sm:$0xff]  }
 0x2c7   :  { %v2006_v26 = vpop.f32.mrb[4].mxu1 }
 0x2c8   :  { %v2008_v27 = vpop.f32.mrb[5].mxu1 }
 0x2c9   :  { %v2010_v28 = vpop.f32.mrb[6].mxu1 }
 0x2ca   :  { %v2011_v4 = vpop.f32.mrb[7].mxu1  ;;  %v4633_v28 = vld [vmem:[#allocation14 + $0x174] ss:$8 sps:$4 sm:$0xff]  }
 0x2cb   :  { %v4631_v4 = vld [vmem:[#allocation14 + $0x170] ss:$8 sps:$4 sm:$0xff]  }
 0x2ef   :  { %v1965_v30 = vpop.f32.mrb[48].mxu0 }
 0x2f0   :  { %v5306_v33 = vadd.f32 %v2006_v26, %v1965_v30  ;;  %v1967_v37 = vpop.f32.mrb[49].mxu0  ;;  %v4630_v26 = vld [vmem:[#allocation14 + $0x164] ss:$8 sps:$4 sm:$0xff]  }
 0x2f1   :  { %v5308_v39 = vadd.f32 %v2008_v27, %v1967_v37  ;;  %v1969_v38 = vpop.f32.mrb[50].mxu0  ;;  %v4628_v27 = vld [vmem:[#allocation14 + $0x160] ss:$8 sps:$4 sm:$0xff]   ;;  %v4636_v30 = vld [vmem:[#allocation14 + $0x184] ss:$8 sps:$4 sm:$0xff]  }
 0x2f2   :  { %v1970_v40 = vpop.f32.mrb[51].mxu0 }
 0x307   :  { %v2770_v42 = vpop.f32.mrb[8].mxu1 }
 0x308   :  { %v2771_v8 = vadd.f32 %v2770_v42, %v1925_v10  ;;  %v2772_v43 = vpop.f32.mrb[9].mxu1  ;;  %v4634_v42 = vld [vmem:[#allocation14 + $0x180] ss:$8 sps:$4 sm:$0xff]  }
 0x309   :  { %v2773_v44 = vadd.f32 %v2772_v43, %v1927_v13  ;;  %v2774_v45 = vpop.f32.mrb[10].mxu1  ;;  %v4610_v13 = vld [vmem:[#allocation14 + $0x100] ss:$8 sps:$4 sm:$0xff]   ;;  %v4639_v43 = vld [vmem:[#allocation14 + $0x194] ss:$8 sps:$4 sm:$0xff]  }
 0x30a   :  { %v2775_v46 = vpop.f32.mrb[11].mxu1  ;;  %v4642_v45 = vld [vmem:[#allocation14 + $0x1a4] ss:$8 sps:$4 sm:$0xff]  }
 0x30b   :  { %v4640_v46 = vld [vmem:[#allocation14 + $0x1a0] ss:$8 sps:$4 sm:$0xff]  }
 0x317   :  { %v2852_v54 = vpop.f32.mrb[12].mxu1 }
 0x318   :  { %v2854_v58 = vpop.f32.mrb[13].mxu1 }
 0x319   :  { %v2856_v59 = vpop.f32.mrb[14].mxu1 }
 0x31a   :  { %v2857_v36 = vpop.f32.mrb[15].mxu1 }
 0x32f   :  { %v2811_v60 = vpop.f32.mrb[52].mxu0 }
 0x330   :  { %v2812_v1 = vadd.f32 %v2811_v60, %v2771_v8  ;;  %v2813_v3 = vpop.f32.mrb[53].mxu0 }
 0x331   :  { %v2814_v62 = vadd.f32 %v2813_v3, %v2773_v44  ;;  %v2815_v2 = vpop.f32.mrb[54].mxu0  ;;  %v4637_v44 = vld [vmem:[#allocation14 + $0x190] ss:$8 sps:$4 sm:$0xff]   ;;  %v2995_v3 = vrot.slane %v5313_v50, %v5158_v49 }
 0x332   :  { %v2853_v0 = vadd.f32 %v2852_v54, %v2812_v1  ;;  %v2816_v6 = vpop.f32.mrb[55].mxu0  ;;  %v4655_v1 = vld [vmem:[#allocation14 + $0x1f0] ss:$8 sps:$4 sm:$0xff]  }
 0x333   :  { %v2855_v35 = vadd.f32 %v2854_v58, %v2814_v62  ;;  %v4672_v49 = vld [vmem:[#allocation15 + $0x78] sm:$0xff]  }
 0x334   :  { %v3004_v7 = vadd.f32 %v2987_v24, %v2853_v0 }
 0x335   :  { %v3005_v9 = vadd.f32 %v2991_v5, %v2855_v35 }
 0x336   :  { %v3008_v10 = vmax.f32 %v3004_v7, 0.0 }
 0x337   :  { %v3009_v11 = vmax.f32 %v3005_v9, 0.0 }
 0x338   :  { %v3012_v14 = vpack.c.bf16 %v3008_v10, %v3008_v10 }
 0x339   :  { %v3013_v12 = vpack.c.bf16 %v3009_v11, %v3009_v11 }
 0x33b   :  { %3444 = vmatprep.mubr.bf16.mxu1 %v3013_v12  ;;  %v4670_v12 = vld [vmem:[#allocation15 + $0x70] sm:$0xff]  }
 0x33c   :  { %3445 = vmatmul.mubr.bf16.vlgmr.msra.gmra.mrb[20].mxu1 %v3012_v14  ;;  %4092 = vmatprep.subr.bf16.mxu0 %v4670_v12  ;;  %v4673_v14 = vld [vmem:[#allocation15 + $0x38] sm:$0xff]  }
 0x33d   :  { %3454 = vmatpush1.bf16.msra.mxu1 %v4610_v13  ;;  %v4671_v13 = vld [vmem:[#allocation15 + $0x30] sm:$0xff]  }
 0x33e   :  { %3455 = vmatprep.subr.bf16.mxu1 %v4615_v16  ;;  %4093 = vmatpush3.bf16.msra.mxu0 %v4671_v13 }
 0x33f   :  { %4094 = vmatprep.subr.bf16.mxu0 %v4672_v49 }
 0x341   :  { %3456 = vmatpush1.bf16.msra.mxu1 %v4613_v17 }
 0x342   :  { %3457 = vmatprep.subr.bf16.mxu1 %v4618_v18  ;;  %4095 = vmatpush3.bf16.msra.mxu0 %v4673_v14 }
 0x345   :  { %3458 = vmatpush1.bf16.msra.mxu1 %v4616_v19 }
 0x346   :  { %3459 = vmatprep.subr.bf16.mxu1 %v4621_v15 }
 0x349   :  { %3460 = vmatpush1.bf16.msra.mxu1 %v4619_v20 }
 0x34a   :  { %3461 = vmatprep.subr.bf16.mxu1 %v4624_v22 }
 0x34d   :  { %3462 = vmatpush1.bf16.msra.mxu1 %v4622_v23 }
 0x34e   :  { %3463 = vmatprep.subr.bf16.mxu1 %v4627_v61 }
 0x351   :  { %3464 = vmatpush1.bf16.msra.mxu1 %v4625_v25 }
 0x352   :  { %3465 = vmatprep.subr.bf16.mxu1 %v4630_v26 }
 0x355   :  { %3466 = vmatpush1.bf16.msra.mxu1 %v4628_v27 }
 0x356   :  { %3467 = vmatprep.subr.bf16.mxu1 %v4633_v28  ;;  %v4060_v28 = vld [vmem:[%s5357_s12] ss:$0 sm:$0xff] }
 0x357   :  { %v2934_v37 = vpop.f32.mrb[16].mxu1 }
 0x358   :  { %v2936_v38 = vpop.f32.mrb[17].mxu1 }
 0x359   :  { %v2938_v40 = vpop.f32.mrb[18].mxu1  ;;  %3468 = vmatpush1.bf16.msra.mxu1 %v4631_v4 }
 0x35a   :  { %v2939_v8 = vpop.f32.mrb[19].mxu1  ;;  %3469 = vmatprep.subr.bf16.mxu1 %v4636_v30 }
 0x35d   :  { %3470 = vmatpush1.bf16.msra.mxu1 %v4634_v42 }
 0x35e   :  { %3471 = vmatprep.subr.bf16.mxu1 %v4639_v43 }
 0x361   :  { %3472 = vmatpush1.bf16.msra.mxu1 %v4637_v44 }
 0x362   :  { %3473 = vmatprep.subr.bf16.mxu1 %v4642_v45 }
 0x365   :  { %3474 = vmatpush1.bf16.msra.mxu1 %v4640_v46 }
 0x366   :  { %3475 = vmatprep.subr.bf16.mxu1 %v4645_v21 }
 0x369   :  { %3476 = vmatpush1.bf16.msra.mxu1 %v4643_v48 }
 0x36a   :  { %3477 = vmatprep.subr.bf16.mxu1 %v4648_v47 }
 0x36d   :  { %3478 = vmatpush1.bf16.msra.mxu1 %v4646_v51 }
 0x36e   :  { %3479 = vmatprep.subr.bf16.mxu1 %v4651_v53 }
 0x36f   :  { %v2893_v41 = vpop.f32.mrb[56].mxu0 }
 0x370   :  { %v2894_v29 = vadd.f32 %v2893_v41, %v5306_v33  ;;  %v2895_v54 = vpop.f32.mrb[57].mxu0  ;;  %v2999_v33 = vrot.slane %v5313_v50, %v5161_v52  ;;  %v3080_v52 = vld [vmem:[%s5355_s10] sm:$0x3]  ;;  %s4903_s10 = smov [#allocation17]  }
 0x371   :  { %v2896_v58 = vadd.f32 %v2895_v54, %v5308_v39  ;;  %v2897_v59 = vpop.f32.mrb[58].mxu0  ;;  %3480 = vmatpush1.bf16.msra.mxu1 %v4649_v56  ;;  %v3085_v50 = vrot.slane %v3080_v52, %v5139_v32  ;;  %v3089_v16 = vrot.slane %v3080_v52, %v5145_v34  ;;  %s3680_s24 = sshll.u32 %s4903_s10, 4  ;;  %s3681_s24 = int_to_ptr.vmem [resolvable:$true] %s3680_s24 }
 0x372   :  { %v2898_v36 = vpop.f32.mrb[59].mxu0  ;;  %v2935_v63 = vadd.f32 %v2934_v37, %v2894_v29  ;;  %3481 = vmatprep.subr.bf16.mxu1 %v4654_v57  ;;  %s4850_s25 = scalar_lea.vmem %s3681_s24, 128  ;;  %p4855_p9 = scmp.lt.s32.totalorder %s3681_s24, %s3681_s24 }
 0x373   :  { %v2937_v60 = vadd.f32 %v2936_v38, %v2896_v58  ;;  %p4851_p8 = scmp.ne.s32.totalorder %s3681_s24, %s4850_s25  ;;  %p4856_p10 = scmp.lt.s32.totalorder %s4850_s25, %s4850_s25 }
 0x375   :  { %3482 = vmatpush1.bf16.msra.mxu1 %v4652_v31  ;;  %p4857_p11 = por %p4856_p10, %p4855_p9 }
 0x376   :  { %3483 = vmatprep.subr.bf16.mxu1 %v4657_v55 }
 0x377   :  { %p4858_p12 = pnand %p4857_p11, %p4851_p8 }
 0x379   :  { %3484 = vmatpush1.bf16.msra.mxu1 %v4655_v1 }
 0x37f   :  { %v2975_v24 = vpop.f32.mrb[60].mxu0 }
 0x380   :  { %v2976_v39 = vadd.f32 %v2975_v24, %v2935_v63  ;;  %v2977_v62 = vpop.f32.mrb[61].mxu0 }
 0x381   :  { %v2978_v2 = vadd.f32 %v2977_v62, %v2937_v60  ;;  %v2979_v5 = vpop.f32.mrb[62].mxu0 }
 0x382   :  { %v3006_v0 = vadd.f32 %v2995_v3, %v2976_v39  ;;  %v2980_v6 = vpop.f32.mrb[63].mxu0 }
 0x383   :  { %v3007_v35 = vadd.f32 %v2999_v33, %v2978_v2 }
 0x384   :  { %v3010_v7 = vmax.f32 %v3006_v0, 0.0 }
 0x385   :  { %v3011_v9 = vmax.f32 %v3007_v35, 0.0 }
 0x386   :  { %v3014_v11 = vpack.c.bf16 %v3010_v7, %v3010_v7 }
 0x387   :  { %v3015_v10 = vpack.c.bf16 %v3011_v9, %v3011_v9 }
 0x389   :  { %3485 = vmatprep.mubr.bf16.mxu1 %v3015_v10 }
 0x38a   :  { %3486 = vmatmul.mubr.bf16.vlgmr.msra.gmra.mrb[20].mxu1 %v3014_v11 }
 0x45d   :  { %v3487_v17 = vpop.f32.mrb[20].mxu1 }
 0x45e   :  { %v4110_v18 = vadd.f32 %v3487_v17, %v3085_v50  ;;  %v3489_v19 = vpop.f32.mrb[21].mxu1 }
 0x45f   :  { %v4111_v15 = vadd.f32 %v3489_v19, %v3089_v16  ;;  %v3491_v20 = vpop.f32.mrb[22].mxu1 }
 0x460   :  { %v3494_v22 = vmax.f32 %v4110_v18, 0.0  ;;  %v3492_v23 = vpop.f32.mrb[23].mxu1 }
 0x461   :  { %v3495_v61 = vmax.f32 %v4111_v15, 0.0 }
 0x462   :  { %v3496_v26 = vpack.c.bf16 %v3494_v22, %v3494_v22 }
 0x463   :  { %v3497_v25 = vpack.c.bf16 %v3495_v61, %v3495_v61 }
 0x465   :  { %3665 = vmatprep.mubr.bf16.mxu0 %v3497_v25 }
 0x466   :  { %3666 = vmatmul.mubr.bf16.vlgmr.msra.gmra.mrb[64].mxu0 %v3496_v26 }
 0x539   :  { %v4096_v27 = vpop.f32.mrb[64].mxu0 }
 0x53a   :  { %v4097_v32 = vpop.f32.mrb[65].mxu0 }
 0x53b   :  { %v4098_v34 = vadd.f32 %v4097_v32, %v4096_v27  ;;  %v4099_v4 = vpop.f32.mrb[66].mxu0 }
 0x53c   :  { %v4100_v30 = vpop.f32.mrb[67].mxu0 }
 0x53d   :  { %v3668_v37 = vadd.f32 %v4098_v34, %v4060_v28 }
 0x53f   :  { %3673 = vst [vmem:[#allocation17] sm:$0xff] %v3668_v37 }
 0x540   :  { %4861 = shalt.err (!%p4858_p12)
}
 0x541   :  { %s4862_s12 = scalar_lea.hbm %s5358_s13, 128 }
 0x542   :  { %p4863_p13 = scmp.ne.s32.totalorder %s5358_s13, %s4862_s12  ;;  %p4866_p0 = scmp.lt.u32.totalorder %s4862_s12, %s5358_s13 }
 0x544   :  { %p4868_p1 = pnand %p4866_p0, %p4863_p13 }
 0x546   :  { %4871 = shalt.err (!%p4868_p1)
}
 0x547   :  { %3683 = dma.vmem_to_hbm [thread:$0]  %s3681_s24, 128, %s5358_s13, [#allocation5]  }
 0x548   :  { %4882 = dma.done.wait [#allocation5], 128  }
 0x549   :  { %4883 = vsyncadd [#allocation5], 4294967168 }
 0x54a   :  { %3687 = vsyncpa [#allocation4], 1 }
 0x54b   :  { %3688 = vsyncpa [#allocation7], 1 }
 0x54c   :  { %3689 = vsyncpa [#allocation10], 1 }
 0x54d   :  { %3690 = vsyncpa [#allocation13], 1 }
 0x54e   :  { %3691 = vsyncpa [#allocation16], 1 }
 0x54f   :  { %3692 = vsyncpa [#allocation5], 1 }

</bundles_post_ra>
